<compile_context>
chip_gen: v6e
topology: v6e:2x2x1
jax: 0.10.0
libtpu: 0.0.40
codegen_flags: <defaults>
</compile_context>

<pallas_src>
import jax
import jax.numpy as jnp
from jax.experimental import pallas as pl
from jax.experimental.pallas import tpu as pltpu

Z_DIM = 100
H1 = 256
H2 = 512
IMG_DIM = 784


def _generator_kernel(z_ref, w1_ref, b1_ref, w2_ref, b2_ref, w3_ref, b3_ref, o_ref):
    z = z_ref[...]                                                     # (tb, 100) bf16

    # Linear(100 -> 256) + LeakyReLU(0.2)   [bf16 MXU matmul, f32 accumulate]
    h1 = jnp.dot(z, w1_ref[...], preferred_element_type=jnp.float32) + b1_ref[...]
    h1 = jnp.where(h1 > 0, h1, 0.2 * h1)

    # Linear(256 -> 512) + LeakyReLU(0.2)
    h2 = jnp.dot(h1.astype(jnp.bfloat16), w2_ref[...],
                 preferred_element_type=jnp.float32) + b2_ref[...]
    h2 = jnp.where(h2 > 0, h2, 0.2 * h2)

    # Linear(512 -> 784) + Tanh
    h3 = jnp.dot(h2.astype(jnp.bfloat16), w3_ref[...],
                 preferred_element_type=jnp.float32) + b3_ref[...]
    o_ref[...] = jnp.tanh(h3)


def _pick_batch_tile(B):
    """Largest tile <= 512 (multiple of 8) dividing B; prefer >= 2 grid steps (v7x 2 TCs)."""
    candidates = (512, 256, 128, 64, 32, 16, 8)
    for c in candidates:
        if B % c == 0 and B // c >= 2:
            return c
    for c in candidates:
        if B % c == 0:
            return c
    return B  # odd/small batch: single full-batch block


def _resident_spec(shape):
    """Weight/bias spec: constant block index -> stays VMEM-resident across grid steps."""
    return pl.BlockSpec(shape, lambda i: (0, 0))


def generator_forward(z, params, *, batch_tile=None):
    """Full Generator forward pass in one Pallas kernel.

    z: (B, 100) float; weights stored as (in_features, out_features) so y = z @ W + b
    (same math as PyTorch's y = z @ W.T + b with W of shape (out, in)).
    returns: (B, 784) float32 in (-1, 1).
    """
    B = z.shape[0]
    tb = _pick_batch_tile(B) if batch_tile is None else batch_tile
    assert B % tb == 0, (B, tb)

    z = z.astype(jnp.bfloat16)
    w1, b1, w2, b2, w3, b3 = (params[k] for k in ("w1", "b1", "w2", "b2", "w3", "b3"))
    w1 = w1.astype(jnp.bfloat16)
    w2 = w2.astype(jnp.bfloat16)
    w3 = w3.astype(jnp.bfloat16)

    grid = (B // tb,)
    return pl.pallas_call(
        _generator_kernel,
        out_shape=jax.ShapeDtypeStruct((B, IMG_DIM), jnp.float32),
        grid_spec=pltpu.PrefetchScalarGridSpec(
            num_scalar_prefetch=0,
            grid=grid,
            in_specs=[
                pl.BlockSpec((tb, Z_DIM), lambda i: (i, 0)),   # z tile (batch-tiled)
                _resident_spec((Z_DIM, H1)),                   # w1
                _resident_spec((1, H1)),                       # b1
                _resident_spec((H1, H2)),                      # w2
                _resident_spec((1, H2)),                       # b2
                _resident_spec((H2, IMG_DIM)),                 # w3
                _resident_spec((1, IMG_DIM)),                  # b3
            ],
            out_specs=pl.BlockSpec((tb, IMG_DIM), lambda i: (i, 0)),
        ),
        compiler_params=pltpu.CompilerParams(
            dimension_semantics=("parallel",),
        ),
    )(z, w1, b1, w2, b2, w3, b3)


def init_params(key):
    """Deterministic init mimicking PyTorch Linear default (uniform +/- 1/sqrt(fan_in))."""
    ks = jax.random.split(key, 6)

    def uinit(k, shape, fan_in):
        bound = float(fan_in) ** -0.5
        return jax.random.uniform(k, shape, jnp.float32, -bound, bound)

    return {
        "w1": uinit(ks[0], (Z_DIM, H1), Z_DIM).astype(jnp.bfloat16),
        "b1": uinit(ks[1], (1, H1), Z_DIM),
        "w2": uinit(ks[2], (H1, H2), H1).astype(jnp.bfloat16),
        "b2": uinit(ks[3], (1, H2), H1),
        "w3": uinit(ks[4], (H2, IMG_DIM), H2).astype(jnp.bfloat16),
        "b3": uinit(ks[5], (1, IMG_DIM), H2),
    }


def _reference_forward(z, p):
    """Pure-JAX reference with the same precision recipe (bf16 matmuls, f32 accum)."""
    zb = z.astype(jnp.bfloat16)
    h1 = jnp.dot(zb, p["w1"].astype(jnp.bfloat16),
                 preferred_element_type=jnp.float32) + p["b1"]
    h1 = jnp.where(h1 > 0, h1, 0.2 * h1)
    h2 = jnp.dot(h1.astype(jnp.bfloat16), p["w2"].astype(jnp.bfloat16),
                 preferred_element_type=jnp.float32) + p["b2"]
    h2 = jnp.where(h2 > 0, h2, 0.2 * h2)
    h3 = jnp.dot(h2.astype(jnp.bfloat16), p["w3"].astype(jnp.bfloat16),
                 preferred_element_type=jnp.float32) + p["b3"]
    return jnp.tanh(h3)


if __name__ == "__main__":
    key = jax.random.PRNGKey(0)
    k_param, k_z = jax.random.split(key)

    params = init_params(k_param)
    B = 8
    z = jax.random.normal(k_z, (B, Z_DIM), jnp.float32)

    out = generator_forward(z, params)
    out = jax.block_until_ready(out)

    ref = _reference_forward(z, params)
    assert out.shape == (B, IMG_DIM), out.shape
    assert jnp.allclose(out, ref, atol=5e-4, rtol=5e-4), "mismatch vs. JAX reference"

    print("KERNEL_OK")
</pallas_src>

<mosaic_0001>
module attributes {stable_mosaic.version = 11 : i64} {
  func.func @_generator_kernel(%arg0: i32, %arg1: memref<8x100xbf16, #tpu.memory_space<vmem>>, %arg2: memref<100x256xbf16, #tpu.memory_space<vmem>>, %arg3: memref<1x256xf32, #tpu.memory_space<vmem>>, %arg4: memref<256x512xbf16, #tpu.memory_space<vmem>>, %arg5: memref<1x512xf32, #tpu.memory_space<vmem>>, %arg6: memref<512x784xbf16, #tpu.memory_space<vmem>>, %arg7: memref<1x784xf32, #tpu.memory_space<vmem>>, %arg8: memref<8x784xf32, #tpu.memory_space<vmem>>) attributes {dimension_semantics = [#tpu.dimension_semantics<parallel>], iteration_bounds = array<i64: 1>, scalar_prefetch = 0 : i64, scratch_operands = 0 : i64, tpu.core_type = #tpu.core_type<tc>, window_params = [{transform_indices = @transform_0, window_bounds = array<i64: 8, 100>}, {pipeline_mode = #tpu.pipeline_mode<synchronous>, transform_indices = @transform_1, window_bounds = array<i64: 100, 256>}, {pipeline_mode = #tpu.pipeline_mode<synchronous>, transform_indices = @transform_2, window_bounds = array<i64: 1, 256>}, {pipeline_mode = #tpu.pipeline_mode<synchronous>, transform_indices = @transform_3, window_bounds = array<i64: 256, 512>}, {pipeline_mode = #tpu.pipeline_mode<synchronous>, transform_indices = @transform_4, window_bounds = array<i64: 1, 512>}, {pipeline_mode = #tpu.pipeline_mode<synchronous>, transform_indices = @transform_5, window_bounds = array<i64: 512, 784>}, {pipeline_mode = #tpu.pipeline_mode<synchronous>, transform_indices = @transform_6, window_bounds = array<i64: 1, 784>}, {transform_indices = @transform_7, window_bounds = array<i64: 8, 784>}]} {
    %c0 = arith.constant 0 : index
    %c0_0 = arith.constant 0 : index
    %0 = vector.load %arg1[%c0, %c0_0] : memref<8x100xbf16, #tpu.memory_space<vmem>>, vector<8x100xbf16>
    %c0_1 = arith.constant 0 : index
    %c0_2 = arith.constant 0 : index
    %1 = vector.load %arg2[%c0_1, %c0_2] : memref<100x256xbf16, #tpu.memory_space<vmem>>, vector<100x256xbf16>
    %cst = arith.constant dense<0.000000e+00> : vector<8x256xf32>
    %2 = tpu.matmul %0, %1, %cst {dimension_numbers = #tpu.dot_dimension_numbers<[1], [0], [0], [1], [0, 0, 1, 1], [], []>} : vector<8x100xbf16>, vector<100x256xbf16>, vector<8x256xf32> -> vector<8x256xf32>
    %c0_3 = arith.constant 0 : index
    %c0_4 = arith.constant 0 : index
    %3 = vector.load %arg3[%c0_3, %c0_4] : memref<1x256xf32, #tpu.memory_space<vmem>>, vector<1x256xf32>
    %4 = vector.broadcast %3 : vector<1x256xf32> to vector<8x256xf32>
    %5 = arith.addf %2, %4 : vector<8x256xf32>
    %cst_5 = arith.constant 0.000000e+00 : f32
    %6 = vector.broadcast %cst_5 : f32 to vector<8x256xf32>
    %7 = arith.cmpf ogt, %5, %6 : vector<8x256xf32>
    %cst_6 = arith.constant 2.000000e-01 : f32
    %8 = vector.broadcast %cst_6 : f32 to vector<8x256xf32>
    %9 = arith.mulf %8, %5 : vector<8x256xf32>
    %10 = arith.select %7, %5, %9 : vector<8x256xi1>, vector<8x256xf32>
    %11 = arith.truncf %10 : vector<8x256xf32> to vector<8x256xbf16>
    %c0_7 = arith.constant 0 : index
    %c0_8 = arith.constant 0 : index
    %12 = vector.load %arg4[%c0_7, %c0_8] : memref<256x512xbf16, #tpu.memory_space<vmem>>, vector<256x512xbf16>
    %cst_9 = arith.constant dense<0.000000e+00> : vector<8x512xf32>
    %13 = tpu.matmul %11, %12, %cst_9 {dimension_numbers = #tpu.dot_dimension_numbers<[1], [0], [0], [1], [0, 0, 1, 1], [], []>} : vector<8x256xbf16>, vector<256x512xbf16>, vector<8x512xf32> -> vector<8x512xf32>
    %c0_10 = arith.constant 0 : index
    %c0_11 = arith.constant 0 : index
    %14 = vector.load %arg5[%c0_10, %c0_11] : memref<1x512xf32, #tpu.memory_space<vmem>>, vector<1x512xf32>
    %15 = vector.broadcast %14 : vector<1x512xf32> to vector<8x512xf32>
    %16 = arith.addf %13, %15 : vector<8x512xf32>
    %cst_12 = arith.constant 0.000000e+00 : f32
    %17 = vector.broadcast %cst_12 : f32 to vector<8x512xf32>
    %18 = arith.cmpf ogt, %16, %17 : vector<8x512xf32>
    %cst_13 = arith.constant 2.000000e-01 : f32
    %19 = vector.broadcast %cst_13 : f32 to vector<8x512xf32>
    %20 = arith.mulf %19, %16 : vector<8x512xf32>
    %21 = arith.select %18, %16, %20 : vector<8x512xi1>, vector<8x512xf32>
    %22 = arith.truncf %21 : vector<8x512xf32> to vector<8x512xbf16>
    %c0_14 = arith.constant 0 : index
    %c0_15 = arith.constant 0 : index
    %23 = vector.load %arg6[%c0_14, %c0_15] : memref<512x784xbf16, #tpu.memory_space<vmem>>, vector<512x784xbf16>
    %cst_16 = arith.constant dense<0.000000e+00> : vector<8x784xf32>
    %24 = tpu.matmul %22, %23, %cst_16 {dimension_numbers = #tpu.dot_dimension_numbers<[1], [0], [0], [1], [0, 0, 1, 1], [], []>} : vector<8x512xbf16>, vector<512x784xbf16>, vector<8x784xf32> -> vector<8x784xf32>
    %c0_17 = arith.constant 0 : index
    %c0_18 = arith.constant 0 : index
    %25 = vector.load %arg7[%c0_17, %c0_18] : memref<1x784xf32, #tpu.memory_space<vmem>>, vector<1x784xf32>
    %26 = vector.broadcast %25 : vector<1x784xf32> to vector<8x784xf32>
    %27 = arith.addf %24, %26 : vector<8x784xf32>
    %28 = math.tanh %27 : vector<8x784xf32>
    %c0_19 = arith.constant 0 : index
    %c0_20 = arith.constant 0 : index
    %29 = vector.load %arg8[%c0_19, %c0_20] : memref<8x784xf32, #tpu.memory_space<vmem>>, vector<8x784xf32>
    tpu.vector_store %arg8[%c0_19, %c0_20], %28 {strides = array<i32>} : memref<8x784xf32, #tpu.memory_space<vmem>>, vector<8x784xf32>,
    return
  }
  func.func @transform_0(%arg0: i32) -> (i32, i32) {
    %c0_i32 = arith.constant 0 : i32
    %c0_i32_0 = arith.constant 0 : i32
    return %arg0, %c0_i32 : i32, i32
  }
  func.func @transform_1(%arg0: i32) -> (i32, i32) {
    %c0_i32 = arith.constant 0 : i32
    %c0_i32_0 = arith.constant 0 : i32
    %c0_i32_1 = arith.constant 0 : i32
    return %c0_i32, %c0_i32_0 : i32, i32
  }
  func.func @transform_2(%arg0: i32) -> (i32, i32) {
    %c0_i32 = arith.constant 0 : i32
    %c0_i32_0 = arith.constant 0 : i32
    %c0_i32_1 = arith.constant 0 : i32
    return %c0_i32, %c0_i32_0 : i32, i32
  }
  func.func @transform_3(%arg0: i32) -> (i32, i32) {
    %c0_i32 = arith.constant 0 : i32
    %c0_i32_0 = arith.constant 0 : i32
    %c0_i32_1 = arith.constant 0 : i32
    return %c0_i32, %c0_i32_0 : i32, i32
  }
  func.func @transform_4(%arg0: i32) -> (i32, i32) {
    %c0_i32 = arith.constant 0 : i32
    %c0_i32_0 = arith.constant 0 : i32
    %c0_i32_1 = arith.constant 0 : i32
    return %c0_i32, %c0_i32_0 : i32, i32
  }
  func.func @transform_5(%arg0: i32) -> (i32, i32) {
    %c0_i32 = arith.constant 0 : i32
    %c0_i32_0 = arith.constant 0 : i32
    %c0_i32_1 = arith.constant 0 : i32
    return %c0_i32, %c0_i32_0 : i32, i32
  }
  func.func @transform_6(%arg0: i32) -> (i32, i32) {
    %c0_i32 = arith.constant 0 : i32
    %c0_i32_0 = arith.constant 0 : i32
    %c0_i32_1 = arith.constant 0 : i32
    return %c0_i32, %c0_i32_0 : i32, i32
  }
  func.func @transform_7(%arg0: i32) -> (i32, i32) {
    %c0_i32 = arith.constant 0 : i32
    %c0_i32_0 = arith.constant 0 : i32
    return %arg0, %c0_i32 : i32, i32
  }
}

</mosaic_0001>

<bundles_post_ra>
// kernel: tpu_custom_call.1
= control target key start
LH: loop header
LB: loop body
LE: loop exit
PB: predicated region body
PF: predicated region fallthrough
CT: control target
= control target key end

     0   :  { %vm123_vm0 = vcmask 1041408   ;;  %v3305_v4 = vmov 0   ;;  %vm119_vm1 = vcmask 818176   ;;  %s4325_s0 = inlined_call_operand.vmem [shape: bf16[8,100], index: 0, kind: input, shape index: {}]   ;;  %s4326_s1 = inlined_call_operand.vmem [shape: bf16[100,256], index: 1, kind: input, shape index: {}]   ;;  %s4327_s2 = inlined_call_operand.vmem [shape: f32[1,256], index: 2, kind: input, shape index: {}]   ;;  %s4328_s3 = inlined_call_operand.vmem [shape: bf16[256,512], index: 3, kind: input, shape index: {}]   ;;  %s4329_s4 = inlined_call_operand.vmem [shape: f32[1,512], index: 4, kind: input, shape index: {}]   ;;  %s4330_s5 = inlined_call_operand.vmem [shape: bf16[512,784], index: 5, kind: input, shape index: {}]   ;;  %s4331_s6 = inlined_call_operand.vmem [shape: f32[1,784], index: 6, kind: input, shape index: {}]   ;;  %s4332_s7 = inlined_call_operand.hbm [shape: f32[8,784], index: 7, kind: output, shape index: {}]  }
   0x1   :  { %v41_v0 = vld [vmem:[%s4326_s1 + $0x60] sm:$0x33]  ;;  %v2835_v3 = vld [vmem:[%s4326_s1 + $0x54] ss:$8 sps:$4 sm:$0xff]   ;;  %162 = vmatprep.mubr.bf16.mxu0 %v3305_v4  ;;  %v2837_v6 = vld [vmem:[%s4326_s1 + $0x50] ss:$8 sps:$4 sm:$0xff]  }
   0x2   :  { %v2496_v1 = vcombine.high %v41_v0, %v41_v0  ;;  %v2495_v2 = vcombine.low %v41_v0, %v41_v0  ;;  %v2838_v7 = vld [vmem:[%s4326_s1 + $0x44] ss:$8 sps:$4 sm:$0xff]   ;;  %v2840_v8 = vld [vmem:[%s4326_s1 + $0x40] ss:$8 sps:$4 sm:$0xff]   ;;  %v2841_v9 = vld [vmem:[%s4326_s1 + $0x34] ss:$8 sps:$4 sm:$0xff]  }
   0x3   :  { %v2853_v10 = vld [vmem:[%s4328_s3 + $0xe4] ss:$16 sps:$4 sm:$0xff]   ;;  %v2843_v11 = vld [vmem:[%s4326_s1 + $0x30] ss:$8 sps:$4 sm:$0xff]   ;;  %v2846_v17 = vld [vmem:[%s4326_s1 + $0x20] ss:$8 sps:$4 sm:$0xff]  }
   0x4   :  { %2497 = vmatprep.subr.msk.bf16.mxu0 %vm123_vm0, %v2496_v1  ;;  %v125_v5 = vsel %vm123_vm0, %v2495_v2, 0  ;;  %585 = vmatprep.subr.bf16.mxu1 %v2853_v10  ;;  %v2858_v12 = vld [vmem:[%s4328_s3 + $0xe0] ss:$16 sps:$4 sm:$0xff]   ;;  %v2859_v13 = vld [vmem:[%s4328_s3 + $0xc4] ss:$16 sps:$4 sm:$0xff]  }
   0x5   :  { %133 = vmatpush1.bf16.msra.mxu0 %v125_v5  ;;  %v2844_v14 = vld [vmem:[%s4326_s1 + $0x24] ss:$8 sps:$4 sm:$0xff]   ;;  %586 = vmatpush1.bf16.msra.mxu1 %v2858_v12  ;;  %v2864_v15 = vld [vmem:[%s4328_s3 + $0xc0] ss:$16 sps:$4 sm:$0xff]   ;;  %v2847_v18 = vld [vmem:[%s4326_s1 + $0x14] ss:$8 sps:$4 sm:$0xff]  }
   0x6   :  { %134 = vmatprep.subr.bf16.mxu0 %v2835_v3  ;;  %587 = vmatprep.subr.bf16.mxu1 %v2859_v13  ;;  %v2865_v16 = vld [vmem:[%s4328_s3 + $0xa4] ss:$16 sps:$4 sm:$0xff]   ;;  %v2870_v19 = vld [vmem:[%s4328_s3 + $0xa0] ss:$16 sps:$4 sm:$0xff]   ;;  %v2857_v26 = vld [vmem:[%s4328_s3 + $0xec] ss:$16 sps:$4 sm:$0xff]  }
   0x7   :  { %v2871_v20 = vld [vmem:[%s4328_s3 + $0x84] ss:$16 sps:$4 sm:$0xff]   ;;  %v2849_v21 = vld [vmem:[%s4326_s1 + $0x10] ss:$8 sps:$4 sm:$0xff]   ;;  %v2852_v25 = vld [vmem:[%s4326_s1] ss:$8 sps:$4 sm:$0xff]  }
   0x8   :  { %v2850_v22 = vld [vmem:[%s4326_s1 + $0x4] ss:$8 sps:$4 sm:$0xff]   ;;  %v2876_v23 = vld [vmem:[%s4328_s3 + $0x80] ss:$16 sps:$4 sm:$0xff]   ;;  %v2855_v30 = vld [vmem:[%s4328_s3 + $0xe8] ss:$16 sps:$4 sm:$0xff]  }
   0x9   :  { %135 = vmatpush1.bf16.msra.mxu0 %v2837_v6  ;;  %588 = vmatpush1.bf16.msra.mxu1 %v2864_v15  ;;  %v2877_v24 = vld [vmem:[%s4328_s3 + $0x64] ss:$16 sps:$4 sm:$0xff]   ;;  %v2882_v27 = vld [vmem:[%s4328_s3 + $0x60] ss:$16 sps:$4 sm:$0xff]   ;;  %v2863_v31 = vld [vmem:[%s4328_s3 + $0xcc] ss:$16 sps:$4 sm:$0xff]  }
   0xa   :  { %136 = vmatprep.subr.bf16.mxu0 %v2838_v7  ;;  %589 = vmatprep.subr.bf16.mxu1 %v2865_v16  ;;  %v2883_v28 = vld [vmem:[%s4328_s3 + $0x44] ss:$16 sps:$4 sm:$0xff]   ;;  %v28_v29 = vld [vmem:[%s4325_s0] sm:$0xf]  ;;  %v2861_v34 = vld [vmem:[%s4328_s3 + $0xc8] ss:$16 sps:$4 sm:$0xff]  }
   0xb   :  { %v2888_v32 = vld [vmem:[%s4328_s3 + $0x40] ss:$16 sps:$4 sm:$0xff]   ;;  %v2889_v33 = vld [vmem:[%s4328_s3 + $0x24] ss:$16 sps:$4 sm:$0xff]   ;;  %v2869_v35 = vld [vmem:[%s4328_s3 + $0xac] ss:$16 sps:$4 sm:$0xff]  }
   0xc   :  { %v2894_v36 = vld [vmem:[%s4328_s3 + $0x20] ss:$16 sps:$4 sm:$0xff]   ;;  %v2895_v37 = vld [vmem:[%s4328_s3 + $0x4] ss:$16 sps:$4 sm:$0xff]   ;;  %v2867_v38 = vld [vmem:[%s4328_s3 + $0xa8] ss:$16 sps:$4 sm:$0xff]  }
   0xd   :  { %137 = vmatpush1.bf16.msra.mxu0 %v2840_v8  ;;  %590 = vmatpush1.bf16.msra.mxu1 %v2870_v19  ;;  %v2875_v39 = vld [vmem:[%s4328_s3 + $0x8c] ss:$16 sps:$4 sm:$0xff]   ;;  %v2900_v40 = vld [vmem:[%s4328_s3] ss:$16 sps:$4 sm:$0xff]   ;;  %v2901_v41 = vld [vmem:[%s4328_s3 + $0x1e4] ss:$16 sps:$4 sm:$0xff]  }
   0xe   :  { %138 = vmatprep.subr.bf16.mxu0 %v2841_v9  ;;  %591 = vmatprep.subr.bf16.mxu1 %v2871_v20  ;;  %v2873_v42 = vld [vmem:[%s4328_s3 + $0x88] ss:$16 sps:$4 sm:$0xff]   ;;  %v2881_v43 = vld [vmem:[%s4328_s3 + $0x6c] ss:$16 sps:$4 sm:$0xff]   ;;  %v2906_v44 = vld [vmem:[%s4328_s3 + $0x1e0] ss:$16 sps:$4 sm:$0xff]  }
   0xf   :  { %v2907_v45 = vld [vmem:[%s4328_s3 + $0x1c4] ss:$16 sps:$4 sm:$0xff]   ;;  %v2879_v46 = vld [vmem:[%s4328_s3 + $0x68] ss:$16 sps:$4 sm:$0xff]   ;;  %v2887_v47 = vld [vmem:[%s4328_s3 + $0x4c] ss:$16 sps:$4 sm:$0xff]  }
  0x10   :  { %v2912_v48 = vld [vmem:[%s4328_s3 + $0x1c0] ss:$16 sps:$4 sm:$0xff]   ;;  %v2913_v49 = vld [vmem:[%s4328_s3 + $0x1a4] ss:$16 sps:$4 sm:$0xff]   ;;  %v2885_v50 = vld [vmem:[%s4328_s3 + $0x48] ss:$16 sps:$4 sm:$0xff]  }
  0x11   :  { %139 = vmatpush1.bf16.msra.mxu0 %v2843_v11  ;;  %592 = vmatpush1.bf16.msra.mxu1 %v2876_v23  ;;  %v2893_v51 = vld [vmem:[%s4328_s3 + $0x2c] ss:$16 sps:$4 sm:$0xff]   ;;  %v2918_v52 = vld [vmem:[%s4328_s3 + $0x1a0] ss:$16 sps:$4 sm:$0xff]   ;;  %v2919_v53 = vld [vmem:[%s4328_s3 + $0x184] ss:$16 sps:$4 sm:$0xff]  }
  0x12   :  { %140 = vmatprep.subr.bf16.mxu0 %v2844_v14  ;;  %593 = vmatprep.subr.bf16.mxu1 %v2877_v24  ;;  %v2891_v54 = vld [vmem:[%s4328_s3 + $0x28] ss:$16 sps:$4 sm:$0xff]   ;;  %v2899_v55 = vld [vmem:[%s4328_s3 + $0xc] ss:$16 sps:$4 sm:$0xff]   ;;  %v2924_v56 = vld [vmem:[%s4328_s3 + $0x180] ss:$16 sps:$4 sm:$0xff]  }
  0x13   :  { %v2925_v57 = vld [vmem:[%s4328_s3 + $0x164] ss:$16 sps:$4 sm:$0xff]   ;;  %v2897_v58 = vld [vmem:[%s4328_s3 + $0x8] ss:$16 sps:$4 sm:$0xff]   ;;  %v2905_v59 = vld [vmem:[%s4328_s3 + $0x1ec] ss:$16 sps:$4 sm:$0xff]  }
  0x14   :  { %v2930_v60 = vld [vmem:[%s4328_s3 + $0x160] ss:$16 sps:$4 sm:$0xff]   ;;  %v2931_v61 = vld [vmem:[%s4328_s3 + $0x144] ss:$16 sps:$4 sm:$0xff]   ;;  %v2903_v62 = vld [vmem:[%s4328_s3 + $0x1e8] ss:$16 sps:$4 sm:$0xff]  }
  0x15   :  { %141 = vmatpush1.bf16.msra.mxu0 %v2846_v17  ;;  %594 = vmatpush1.bf16.msra.mxu1 %v2882_v27  ;;  %v2911_v63 = vld [vmem:[%s4328_s3 + $0x1cc] ss:$16 sps:$4 sm:$0xff]   ;;  %v2909_v0 = vld [vmem:[%s4328_s3 + $0x1c8] ss:$16 sps:$4 sm:$0xff]   ;;  %v2936_v9 = vld [vmem:[%s4328_s3 + $0x140] ss:$16 sps:$4 sm:$0xff]  }
  0x16   :  { %142 = vmatprep.subr.bf16.mxu0 %v2847_v18  ;;  %595 = vmatprep.subr.bf16.mxu1 %v2883_v28  ;;  %v2917_v1 = vld [vmem:[%s4328_s3 + $0x1ac] ss:$16 sps:$4 sm:$0xff]   ;;  %v2915_v2 = vld [vmem:[%s4328_s3 + $0x1a8] ss:$16 sps:$4 sm:$0xff]   ;;  %v2937_v10 = vld [vmem:[%s4328_s3 + $0x124] ss:$16 sps:$4 sm:$0xff]  }
  0x17   :  { %v2923_v3 = vld [vmem:[%s4328_s3 + $0x18c] ss:$16 sps:$4 sm:$0xff]   ;;  %v2921_v4 = vld [vmem:[%s4328_s3 + $0x188] ss:$16 sps:$4 sm:$0xff]   ;;  %v2942_v13 = vld [vmem:[%s4328_s3 + $0x120] ss:$16 sps:$4 sm:$0xff]  }
  0x18   :  { %v2929_v5 = vld [vmem:[%s4328_s3 + $0x16c] ss:$16 sps:$4 sm:$0xff]   ;;  %v2927_v6 = vld [vmem:[%s4328_s3 + $0x168] ss:$16 sps:$4 sm:$0xff]   ;;  %v2943_v14 = vld [vmem:[%s4328_s3 + $0x104] ss:$16 sps:$4 sm:$0xff]  }
  0x19   :  { %143 = vmatpush1.bf16.msra.mxu0 %v2849_v21  ;;  %596 = vmatpush1.bf16.msra.mxu1 %v2888_v32  ;;  %v2935_v7 = vld [vmem:[%s4328_s3 + $0x14c] ss:$16 sps:$4 sm:$0xff]   ;;  %v2933_v8 = vld [vmem:[%s4328_s3 + $0x148] ss:$16 sps:$4 sm:$0xff]   ;;  %v2948_v17 = vld [vmem:[%s4328_s3 + $0x100] ss:$16 sps:$4 sm:$0xff]  }
  0x1a   :  { %144 = vmatprep.subr.bf16.mxu0 %v2850_v22  ;;  %597 = vmatprep.subr.bf16.mxu1 %v2889_v33  ;;  %v2941_v11 = vld [vmem:[%s4328_s3 + $0x12c] ss:$16 sps:$4 sm:$0xff]   ;;  %v2939_v12 = vld [vmem:[%s4328_s3 + $0x128] ss:$16 sps:$4 sm:$0xff]  }
  0x1b   :  { %v2947_v15 = vld [vmem:[%s4328_s3 + $0x10c] ss:$16 sps:$4 sm:$0xff]   ;;  %v2945_v16 = vld [vmem:[%s4328_s3 + $0x108] ss:$16 sps:$4 sm:$0xff]  }
  0x1c   :  { %v2951_v18 = vld [vmem:[%s4330_s5 + $0x18c] ss:$28 sps:$4 sm:$0xff]  }
  0x1d   :  { %145 = vmatpush1.bf16.msra.mxu0 %v2852_v25  ;;  %598 = vmatpush1.bf16.msra.mxu1 %v2894_v36  ;;  %v2954_v19 = vld [vmem:[%s4330_s5 + $0x50c] ss:$28 sps:$4 sm:$0xff]  }
  0x1e   :  { %626 = vmatprep.subr.bf16.mxu0 %v2857_v26  ;;  %599 = vmatprep.subr.bf16.mxu1 %v2895_v37 }
  0x20   :  { %2498 = vmatmul.mubr.msk.bf16.vlgmr.msra.gmra.mxu0 %vm119_vm1, %v28_v29 }
  0x21   :  { %627 = vmatpush1.bf16.msra.mxu0 %v2855_v30  ;;  %600 = vmatpush1.bf16.msra.mxu1 %v2900_v40 }
  0x22   :  { %628 = vmatprep.subr.bf16.mxu0 %v2863_v31  ;;  %601 = vmatprep.subr.bf16.mxu1 %v2901_v41 }
  0x25   :  { %629 = vmatpush1.bf16.msra.mxu0 %v2861_v34  ;;  %602 = vmatpush2.bf16.msra.mxu1 %v2906_v44 }
  0x26   :  { %630 = vmatprep.subr.bf16.mxu0 %v2869_v35  ;;  %603 = vmatprep.subr.bf16.mxu1 %v2907_v45 }
  0x29   :  { %631 = vmatpush1.bf16.msra.mxu0 %v2867_v38  ;;  %604 = vmatpush2.bf16.msra.mxu1 %v2912_v48 }
  0x2a   :  { %632 = vmatprep.subr.bf16.mxu0 %v2875_v39  ;;  %605 = vmatprep.subr.bf16.mxu1 %v2913_v49 }
  0x2d   :  { %633 = vmatpush1.bf16.msra.mxu0 %v2873_v42  ;;  %606 = vmatpush2.bf16.msra.mxu1 %v2918_v52 }
  0x2e   :  { %634 = vmatprep.subr.bf16.mxu0 %v2881_v43  ;;  %607 = vmatprep.subr.bf16.mxu1 %v2919_v53 }
  0x31   :  { %635 = vmatpush1.bf16.msra.mxu0 %v2879_v46  ;;  %608 = vmatpush2.bf16.msra.mxu1 %v2924_v56 }
  0x32   :  { %636 = vmatprep.subr.bf16.mxu0 %v2887_v47  ;;  %609 = vmatprep.subr.bf16.mxu1 %v2925_v57 }
  0x35   :  { %637 = vmatpush1.bf16.msra.mxu0 %v2885_v50  ;;  %610 = vmatpush2.bf16.msra.mxu1 %v2930_v60 }
  0x36   :  { %638 = vmatprep.subr.bf16.mxu0 %v2893_v51  ;;  %611 = vmatprep.subr.bf16.mxu1 %v2931_v61 }
  0x39   :  { %639 = vmatpush1.bf16.msra.mxu0 %v2891_v54  ;;  %612 = vmatpush2.bf16.msra.mxu1 %v2936_v9 }
  0x3a   :  { %640 = vmatprep.subr.bf16.mxu0 %v2899_v55  ;;  %613 = vmatprep.subr.bf16.mxu1 %v2937_v10 }
  0x3d   :  { %641 = vmatpush1.bf16.msra.mxu0 %v2897_v58  ;;  %614 = vmatpush2.bf16.msra.mxu1 %v2942_v13 }
  0x3e   :  { %642 = vmatprep.subr.bf16.mxu0 %v2905_v59  ;;  %615 = vmatprep.subr.bf16.mxu1 %v2943_v14 }
  0x41   :  { %643 = vmatpush2.bf16.msra.mxu0 %v2903_v62  ;;  %616 = vmatpush2.bf16.msra.mxu1 %v2948_v17 }
  0x42   :  { %644 = vmatprep.subr.bf16.mxu0 %v2911_v63  ;;  %2128 = vmatprep.subr.bf16.mxu1 %v2951_v18 }
  0x45   :  { %645 = vmatpush2.bf16.msra.mxu0 %v2909_v0 }
  0x46   :  { %646 = vmatprep.subr.bf16.mxu0 %v2917_v1 }
  0x49   :  { %647 = vmatpush2.bf16.msra.mxu0 %v2915_v2 }
  0x4a   :  { %648 = vmatprep.subr.bf16.mxu0 %v2923_v3 }
  0x4d   :  { %649 = vmatpush2.bf16.msra.mxu0 %v2921_v4 }
  0x4e   :  { %650 = vmatprep.subr.bf16.mxu0 %v2929_v5 }
  0x51   :  { %651 = vmatpush2.bf16.msra.mxu0 %v2927_v6 }
  0x52   :  { %652 = vmatprep.subr.bf16.mxu0 %v2935_v7 }
  0x55   :  { %653 = vmatpush2.bf16.msra.mxu0 %v2933_v8 }
  0x56   :  { %654 = vmatprep.subr.bf16.mxu0 %v2941_v11 }
  0x59   :  { %655 = vmatpush2.bf16.msra.mxu0 %v2939_v12 }
  0x5a   :  { %656 = vmatprep.subr.bf16.mxu0 %v2947_v15 }
  0x5d   :  { %657 = vmatpush2.bf16.msra.mxu0 %v2945_v16 }
  0x5e   :  { %2169 = vmatprep.subr.bf16.mxu0 %v2954_v19 }
  0x5f   :  { %12 = vsyncpa [#allocation3], 0  ;;  %v44_v20 = vlaneseq  ;;  %v42_v23 = vld [vmem:[%s4327_s2] sm:$0x3]  ;;  %v2949_v38 = vld [vmem:[%s4330_s5 + $0x188] ss:$28 sps:$4 sm:$0xff]  }
  0x60   :  { %v2952_v39 = vld [vmem:[%s4330_s5 + $0x508] ss:$28 sps:$4 sm:$0xff]   ;;  %v2957_v41 = vld [vmem:[%s4330_s5 + $0x154] ss:$28 sps:$4 sm:$0xff]   ;;  %v2963_v45 = vld [vmem:[%s4330_s5 + $0x11c] ss:$28 sps:$4 sm:$0xff]  }
  0x61   :  { %v3587_v21 = vshrl.u32 %v44_v20, 7  ;;  %v2960_v42 = vld [vmem:[%s4330_s5 + $0x4d4] ss:$28 sps:$4 sm:$0xff]   ;;  %v2966_v46 = vld [vmem:[%s4330_s5 + $0x49c] ss:$28 sps:$4 sm:$0xff]   ;;  %vm2467_vm8 = vcmask 130048  }
  0x62   :  { %v2955_v43 = vld [vmem:[%s4330_s5 + $0x150] ss:$28 sps:$4 sm:$0xff]   ;;  %v2961_v47 = vld [vmem:[%s4330_s5 + $0x118] ss:$28 sps:$4 sm:$0xff]   ;;  %v2969_v49 = vld [vmem:[%s4330_s5 + $0xe4] ss:$28 sps:$4 sm:$0xff]  }
  0x63   :  { %v3590_v22 = vsub.s32 0, %v3587_v21  ;;  %v3596_v24 = vsub.s32 1, %v3587_v21  ;;  %v2958_v44 = vld [vmem:[%s4330_s5 + $0x4d0] ss:$28 sps:$4 sm:$0xff]   ;;  %v2964_v48 = vld [vmem:[%s4330_s5 + $0x498] ss:$28 sps:$4 sm:$0xff]  }
  0x64   :  { %v2972_v50 = vld [vmem:[%s4330_s5 + $0x464] ss:$28 sps:$4 sm:$0xff]   ;;  %v2975_v53 = vld [vmem:[%s4330_s5 + $0xac] ss:$28 sps:$4 sm:$0xff]   ;;  %v2981_v57 = vld [vmem:[%s4330_s5 + $0x74] ss:$28 sps:$4 sm:$0xff]  }
  0x65   :  { %v47_v25 = vrot.slane %v42_v23, %v3590_v22  ;;  %v51_v26 = vrot.slane %v42_v23, %v3596_v24  ;;  %v2967_v51 = vld [vmem:[%s4330_s5 + $0xe0] ss:$28 sps:$4 sm:$0xff]   ;;  %v2978_v54 = vld [vmem:[%s4330_s5 + $0x42c] ss:$28 sps:$4 sm:$0xff]   ;;  %v2984_v58 = vld [vmem:[%s4330_s5 + $0x3f4] ss:$28 sps:$4 sm:$0xff]  }
  0x66   :  { %v2970_v52 = vld [vmem:[%s4330_s5 + $0x460] ss:$28 sps:$4 sm:$0xff]   ;;  %v2973_v55 = vld [vmem:[%s4330_s5 + $0xa8] ss:$28 sps:$4 sm:$0xff]   ;;  %v2979_v59 = vld [vmem:[%s4330_s5 + $0x70] ss:$28 sps:$4 sm:$0xff]  }
  0x67   :  { %v2976_v56 = vld [vmem:[%s4330_s5 + $0x428] ss:$28 sps:$4 sm:$0xff]   ;;  %v2982_v60 = vld [vmem:[%s4330_s5 + $0x3f0] ss:$28 sps:$4 sm:$0xff]   ;;  %v2987_v61 = vld [vmem:[%s4330_s5 + $0x3c] ss:$28 sps:$4 sm:$0xff]  }
  0x68   :  { %v2990_v62 = vld [vmem:[%s4330_s5 + $0x3bc] ss:$28 sps:$4 sm:$0xff]   ;;  %v2993_v1 = vld [vmem:[%s4330_s5 + $0x4] ss:$28 sps:$4 sm:$0xff]   ;;  %v2999_v5 = vld [vmem:[%s4330_s5 + $0x34c] ss:$28 sps:$4 sm:$0xff]  }
  0x69   :  { %v2985_v63 = vld [vmem:[%s4330_s5 + $0x38] ss:$28 sps:$4 sm:$0xff]   ;;  %v2996_v2 = vld [vmem:[%s4330_s5 + $0x384] ss:$28 sps:$4 sm:$0xff]   ;;  %v3002_v6 = vld [vmem:[%s4330_s5 + $0x6cc] ss:$28 sps:$4 sm:$0xff]  }
  0x6a   :  { %v2988_v0 = vld [vmem:[%s4330_s5 + $0x3b8] ss:$28 sps:$4 sm:$0xff]   ;;  %v2991_v3 = vld [vmem:[%s4330_s5] ss:$28 sps:$4 sm:$0xff]   ;;  %v2997_v7 = vld [vmem:[%s4330_s5 + $0x348] ss:$28 sps:$4 sm:$0xff]  }
  0x6b   :  { %v2994_v4 = vld [vmem:[%s4330_s5 + $0x380] ss:$28 sps:$4 sm:$0xff]   ;;  %v3000_v8 = vld [vmem:[%s4330_s5 + $0x6c8] ss:$28 sps:$4 sm:$0xff]   ;;  %v3005_v9 = vld [vmem:[%s4330_s5 + $0x314] ss:$28 sps:$4 sm:$0xff]  }
  0x6c   :  { %v3008_v10 = vld [vmem:[%s4330_s5 + $0x694] ss:$28 sps:$4 sm:$0xff]   ;;  %v3011_v13 = vld [vmem:[%s4330_s5 + $0x2dc] ss:$28 sps:$4 sm:$0xff]   ;;  %v3017_v17 = vld [vmem:[%s4330_s5 + $0x2a4] ss:$28 sps:$4 sm:$0xff]  }
  0x6d   :  { %v3003_v11 = vld [vmem:[%s4330_s5 + $0x310] ss:$28 sps:$4 sm:$0xff]   ;;  %v3014_v14 = vld [vmem:[%s4330_s5 + $0x65c] ss:$28 sps:$4 sm:$0xff]   ;;  %v3020_v18 = vld [vmem:[%s4330_s5 + $0x624] ss:$28 sps:$4 sm:$0xff]  }
  0x6e   :  { %v3006_v12 = vld [vmem:[%s4330_s5 + $0x690] ss:$28 sps:$4 sm:$0xff]   ;;  %v3009_v15 = vld [vmem:[%s4330_s5 + $0x2d8] ss:$28 sps:$4 sm:$0xff]   ;;  %v3015_v19 = vld [vmem:[%s4330_s5 + $0x2a0] ss:$28 sps:$4 sm:$0xff]  }
  0x6f   :  { %v3012_v16 = vld [vmem:[%s4330_s5 + $0x658] ss:$28 sps:$4 sm:$0xff]   ;;  %v3018_v20 = vld [vmem:[%s4330_s5 + $0x620] ss:$28 sps:$4 sm:$0xff]   ;;  %v3023_v23 = vld [vmem:[%s4330_s5 + $0x26c] ss:$28 sps:$4 sm:$0xff]  }
  0xe0   :  { %v164_v27 = vpop.f32.mrf.mxu0 }
  0xe1   :  { %v165_v28 = vadd.f32 %v164_v27, %v47_v25  ;;  %v3026_v25 = vld [vmem:[%s4330_s5 + $0x5ec] ss:$28 sps:$4 sm:$0xff]  }
  0xe2   :  { %v166_v29 = vpop.f32.mrf.mxu0  ;;  %v3024_v27 = vld [vmem:[%s4330_s5 + $0x5e8] ss:$28 sps:$4 sm:$0xff]  }
  0xe3   :  { %vm171_vm2 = vcmp.gt.f32.partialorder %v165_v28, 0.0  ;;  %v173_v30 = vmul.f32 0.2, %v165_v28  ;;  %v167_v31 = vadd.f32 %v166_v29, %v51_v26  ;;  %v3021_v26 = vld [vmem:[%s4330_s5 + $0x268] ss:$28 sps:$4 sm:$0xff]  }
  0xe4   :  { %v168_v32 = vpop.f32.mrf.mxu0  ;;  %v3032_v29 = vld [vmem:[%s4330_s5 + $0x5b4] ss:$28 sps:$4 sm:$0xff]  }
  0xe5   :  { %v174_v33 = vmul.f32 0.2, %v167_v31  ;;  %vm172_vm3 = vcmp.gt.f32.partialorder %v167_v31, 0.0  ;;  %v175_v35 = vsel %vm171_vm2, %v165_v28, %v173_v30  ;;  %v3029_v28 = vld [vmem:[%s4330_s5 + $0x234] ss:$28 sps:$4 sm:$0xff]  }
  0xe6   :  { %v169_v34 = vpop.f32.mrf.mxu0  ;;  %v177_v40 = vpack.c.bf16 %v175_v35, %v175_v35  ;;  %v3027_v30 = vld [vmem:[%s4330_s5 + $0x230] ss:$28 sps:$4 sm:$0xff]   ;;  %v3035_v32 = vld [vmem:[%s4330_s5 + $0x1fc] ss:$28 sps:$4 sm:$0xff]  }
  0xe7   :  { %v176_v36 = vsel %vm172_vm3, %v167_v31, %v174_v33  ;;  %v3030_v31 = vld [vmem:[%s4330_s5 + $0x5b0] ss:$28 sps:$4 sm:$0xff]   ;;  %v3038_v33 = vld [vmem:[%s4330_s5 + $0x57c] ss:$28 sps:$4 sm:$0xff]  }
  0xe8   :  { %v178_v37 = vpack.c.bf16 %v176_v36, %v176_v36  ;;  %v3033_v34 = vld [vmem:[%s4330_s5 + $0x1f8] ss:$28 sps:$4 sm:$0xff]   ;;  %v3041_v36 = vld [vmem:[%s4330_s5 + $0x1c4] ss:$28 sps:$4 sm:$0xff]  }
  0xe9   :  { %v3036_v35 = vld [vmem:[%s4330_s5 + $0x578] ss:$28 sps:$4 sm:$0xff]  }
  0xea   :  { %617 = vmatprep.mubr.bf16.mxu1 %v178_v37  ;;  %658 = vmatprep.mubr.bf16.mxu0 %v178_v37  ;;  %v3044_v37 = vld [vmem:[%s4330_s5 + $0x544] ss:$28 sps:$4 sm:$0xff]  }
  0xeb   :  { %618 = vmatmul.mubr.bf16.vlgmr.msra.gmra.mxu1 %v177_v40  ;;  %659 = vmatmul.mubr.bf16.vlgmr.msra.gmra.mxu0 %v177_v40  ;;  %v3047_v40 = vld [vmem:[%s4330_s5 + $0x194] ss:$28 sps:$4 sm:$0xff]  }
  0xec   :  { %2129 = vmatpush1.bf16.msra.mxu1 %v2949_v38  ;;  %2170 = vmatpush1.bf16.msra.mxu0 %v2952_v39  ;;  %v3039_v38 = vld [vmem:[%s4330_s5 + $0x1c0] ss:$28 sps:$4 sm:$0xff]  }
  0xed   :  { %2130 = vmatprep.subr.bf16.mxu1 %v2957_v41  ;;  %2171 = vmatprep.subr.bf16.mxu0 %v2960_v42  ;;  %v3042_v39 = vld [vmem:[%s4330_s5 + $0x540] ss:$28 sps:$4 sm:$0xff]   ;;  %v3050_v41 = vld [vmem:[%s4330_s5 + $0x514] ss:$28 sps:$4 sm:$0xff]   ;;  %v255_v42 = vsub.s32 2, %v3587_v21 }
  0xf0   :  { %2131 = vmatpush1.bf16.msra.mxu1 %v2955_v43  ;;  %2172 = vmatpush1.bf16.msra.mxu0 %v2958_v44  ;;  %v243_v43 = vld [vmem:[%s4329_s4] sm:$0xf]  ;;  %v259_v44 = vsub.s32 3, %v3587_v21 }
  0xf1   :  { %2132 = vmatprep.subr.bf16.mxu1 %v2963_v45  ;;  %2173 = vmatprep.subr.bf16.mxu0 %v2966_v46  ;;  %v248_v45 = vrot.slane %v243_v43, %v3590_v22  ;;  %v256_v46 = vrot.slane %v243_v43, %v255_v42 }
  0xf4   :  { %2133 = vmatpush1.bf16.msra.mxu1 %v2961_v47  ;;  %2174 = vmatpush1.bf16.msra.mxu0 %v2964_v48 }
  0xf5   :  { %2134 = vmatprep.subr.bf16.mxu1 %v2969_v49  ;;  %2175 = vmatprep.subr.bf16.mxu0 %v2972_v50  ;;  %v252_v49 = vrot.slane %v243_v43, %v3596_v24  ;;  %v260_v50 = vrot.slane %v243_v43, %v259_v44  ;;  %v3095_v43 = vld [vmem:[%s4330_s5 + $0x354] ss:$28 sps:$4 sm:$0xff]  }
  0xf8   :  { %2135 = vmatpush1.bf16.msra.mxu1 %v2967_v51  ;;  %2176 = vmatpush1.bf16.msra.mxu0 %v2970_v52 }
  0xf9   :  { %2136 = vmatprep.subr.bf16.mxu1 %v2975_v53  ;;  %2177 = vmatprep.subr.bf16.mxu0 %v2978_v54 }
  0xfc   :  { %2137 = vmatpush1.bf16.msra.mxu1 %v2973_v55  ;;  %2178 = vmatpush1.bf16.msra.mxu0 %v2976_v56 }
  0xfd   :  { %2138 = vmatprep.subr.bf16.mxu1 %v2981_v57  ;;  %2179 = vmatprep.subr.bf16.mxu0 %v2984_v58 }
 0x100   :  { %2139 = vmatpush1.bf16.msra.mxu1 %v2979_v59  ;;  %2180 = vmatpush1.bf16.msra.mxu0 %v2982_v60 }
 0x101   :  { %2140 = vmatprep.subr.bf16.mxu1 %v2987_v61  ;;  %2181 = vmatprep.subr.bf16.mxu0 %v2990_v62 }
 0x104   :  { %2141 = vmatpush1.bf16.msra.mxu1 %v2985_v63  ;;  %2182 = vmatpush1.bf16.msra.mxu0 %v2988_v0 }
 0x105   :  { %2142 = vmatprep.subr.bf16.mxu1 %v2993_v1  ;;  %2183 = vmatprep.subr.bf16.mxu0 %v2996_v2 }
 0x108   :  { %2143 = vmatpush1.bf16.msra.mxu1 %v2991_v3  ;;  %2184 = vmatpush1.bf16.msra.mxu0 %v2994_v4 }
 0x109   :  { %2144 = vmatprep.subr.bf16.mxu1 %v2999_v5  ;;  %2185 = vmatprep.subr.bf16.mxu0 %v3002_v6  ;;  %v3045_v6 = vld [vmem:[%s4330_s5 + $0x190] ss:$28 sps:$4 sm:$0xff]  }
 0x10c   :  { %2145 = vmatpush2.bf16.msra.mxu1 %v2997_v7  ;;  %2186 = vmatpush2.bf16.msra.mxu0 %v3000_v8 }
 0x10d   :  { %2146 = vmatprep.subr.bf16.mxu1 %v3005_v9  ;;  %2187 = vmatprep.subr.bf16.mxu0 %v3008_v10  ;;  %v3048_v9 = vld [vmem:[%s4330_s5 + $0x510] ss:$28 sps:$4 sm:$0xff]  }
 0x110   :  { %2147 = vmatpush2.bf16.msra.mxu1 %v3003_v11  ;;  %2188 = vmatpush2.bf16.msra.mxu0 %v3006_v12  ;;  %v3053_v11 = vld [vmem:[%s4330_s5 + $0x15c] ss:$28 sps:$4 sm:$0xff]  }
 0x111   :  { %2148 = vmatprep.subr.bf16.mxu1 %v3011_v13  ;;  %2189 = vmatprep.subr.bf16.mxu0 %v3014_v14  ;;  %v3056_v12 = vld [vmem:[%s4330_s5 + $0x4dc] ss:$28 sps:$4 sm:$0xff]  }
 0x112   :  { %v3051_v13 = vld [vmem:[%s4330_s5 + $0x158] ss:$28 sps:$4 sm:$0xff]  }
 0x113   :  { %v3054_v14 = vld [vmem:[%s4330_s5 + $0x4d8] ss:$28 sps:$4 sm:$0xff]  }
 0x114   :  { %2149 = vmatpush2.bf16.msra.mxu1 %v3009_v15  ;;  %2190 = vmatpush2.bf16.msra.mxu0 %v3012_v16  ;;  %v3059_v15 = vld [vmem:[%s4330_s5 + $0x124] ss:$28 sps:$4 sm:$0xff]  }
 0x115   :  { %2150 = vmatprep.subr.bf16.mxu1 %v3017_v17  ;;  %2191 = vmatprep.subr.bf16.mxu0 %v3020_v18  ;;  %v3062_v16 = vld [vmem:[%s4330_s5 + $0x4a4] ss:$28 sps:$4 sm:$0xff]  }
 0x116   :  { %v3057_v17 = vld [vmem:[%s4330_s5 + $0x120] ss:$28 sps:$4 sm:$0xff]  }
 0x117   :  { %v3060_v18 = vld [vmem:[%s4330_s5 + $0x4a0] ss:$28 sps:$4 sm:$0xff]  }
 0x118   :  { %2151 = vmatpush2.bf16.msra.mxu1 %v3015_v19  ;;  %2192 = vmatpush2.bf16.msra.mxu0 %v3018_v20  ;;  %v3065_v19 = vld [vmem:[%s4330_s5 + $0xec] ss:$28 sps:$4 sm:$0xff]  }
 0x119   :  { %2152 = vmatprep.subr.bf16.mxu1 %v3023_v23  ;;  %2193 = vmatprep.subr.bf16.mxu0 %v3026_v25  ;;  %v3068_v20 = vld [vmem:[%s4330_s5 + $0x46c] ss:$28 sps:$4 sm:$0xff]  }
 0x11a   :  { %v3063_v23 = vld [vmem:[%s4330_s5 + $0xe8] ss:$28 sps:$4 sm:$0xff]  }
 0x11b   :  { %v3066_v25 = vld [vmem:[%s4330_s5 + $0x468] ss:$28 sps:$4 sm:$0xff]  }
 0x11c   :  { %2153 = vmatpush2.bf16.msra.mxu1 %v3021_v26  ;;  %2194 = vmatpush2.bf16.msra.mxu0 %v3024_v27  ;;  %v3071_v26 = vld [vmem:[%s4330_s5 + $0xb4] ss:$28 sps:$4 sm:$0xff]  }
 0x11d   :  { %2154 = vmatprep.subr.bf16.mxu1 %v3029_v28  ;;  %2195 = vmatprep.subr.bf16.mxu0 %v3032_v29  ;;  %v3074_v27 = vld [vmem:[%s4330_s5 + $0x434] ss:$28 sps:$4 sm:$0xff]  }
 0x11e   :  { %v3069_v28 = vld [vmem:[%s4330_s5 + $0xb0] ss:$28 sps:$4 sm:$0xff]  }
 0x11f   :  { %v3072_v29 = vld [vmem:[%s4330_s5 + $0x430] ss:$28 sps:$4 sm:$0xff]  }
 0x120   :  { %2155 = vmatpush2.bf16.msra.mxu1 %v3027_v30  ;;  %2196 = vmatpush2.bf16.msra.mxu0 %v3030_v31  ;;  %v3077_v30 = vld [vmem:[%s4330_s5 + $0x7c] ss:$28 sps:$4 sm:$0xff]  }
 0x121   :  { %2156 = vmatprep.subr.bf16.mxu1 %v3035_v32  ;;  %2197 = vmatprep.subr.bf16.mxu0 %v3038_v33  ;;  %v3080_v31 = vld [vmem:[%s4330_s5 + $0x3fc] ss:$28 sps:$4 sm:$0xff]  }
 0x122   :  { %v3075_v32 = vld [vmem:[%s4330_s5 + $0x78] ss:$28 sps:$4 sm:$0xff]  }
 0x123   :  { %v3078_v33 = vld [vmem:[%s4330_s5 + $0x3f8] ss:$28 sps:$4 sm:$0xff]  }
 0x124   :  { %2157 = vmatpush2.bf16.msra.mxu1 %v3033_v34  ;;  %2198 = vmatpush2.bf16.msra.mxu0 %v3036_v35  ;;  %v3083_v34 = vld [vmem:[%s4330_s5 + $0x44] ss:$28 sps:$4 sm:$0xff]  }
 0x125   :  { %2158 = vmatprep.subr.bf16.mxu1 %v3041_v36  ;;  %2199 = vmatprep.subr.bf16.mxu0 %v3044_v37  ;;  %v3086_v35 = vld [vmem:[%s4330_s5 + $0x3c4] ss:$28 sps:$4 sm:$0xff]  }
 0x126   :  { %v3081_v36 = vld [vmem:[%s4330_s5 + $0x40] ss:$28 sps:$4 sm:$0xff]  }
 0x127   :  { %v3084_v37 = vld [vmem:[%s4330_s5 + $0x3c0] ss:$28 sps:$4 sm:$0xff]  }
 0x128   :  { %2159 = vmatpush2.bf16.msra.mxu1 %v3039_v38  ;;  %2200 = vmatpush2.bf16.msra.mxu0 %v3042_v39  ;;  %v3089_v38 = vld [vmem:[%s4330_s5 + $0xc] ss:$28 sps:$4 sm:$0xff]  }
 0x129   :  { %2210 = vmatprep.subr.bf16.mxu1 %v3047_v40  ;;  %2251 = vmatprep.subr.bf16.mxu0 %v3050_v41  ;;  %v3092_v39 = vld [vmem:[%s4330_s5 + $0x38c] ss:$28 sps:$4 sm:$0xff]  }
 0x12a   :  { %v3087_v40 = vld [vmem:[%s4330_s5 + $0x8] ss:$28 sps:$4 sm:$0xff]  }
 0x12b   :  { %v3090_v41 = vld [vmem:[%s4330_s5 + $0x388] ss:$28 sps:$4 sm:$0xff]  }
 0x1ab   :  { %v619_v47 = vpop.f32.mrf.mxu1  ;;  %v660_v48 = vpop.f32.mrf.mxu0 }
 0x1ac   :  { %v620_v51 = vadd.f32 %v619_v47, %v248_v45  ;;  %v661_v52 = vadd.f32 %v660_v48, %v256_v46  ;;  %v3098_v45 = vld [vmem:[%s4330_s5 + $0x6d4] ss:$28 sps:$4 sm:$0xff]   ;;  %v3101_v48 = vld [vmem:[%s4330_s5 + $0x31c] ss:$28 sps:$4 sm:$0xff]  }
 0x1ad   :  { %v621_v53 = vpop.f32.mrf.mxu1  ;;  %v662_v54 = vpop.f32.mrf.mxu0  ;;  %v3093_v46 = vld [vmem:[%s4330_s5 + $0x350] ss:$28 sps:$4 sm:$0xff]  }
 0x1ae   :  { %v671_v55 = vmul.f32 0.2, %v620_v51  ;;  %vm667_vm4 = vcmp.gt.f32.partialorder %v620_v51, 0.0  ;;  %v673_v56 = vmul.f32 0.2, %v661_v52  ;;  %v622_v57 = vadd.f32 %v621_v53, %v252_v49 }
 0x1af   :  { %v663_v58 = vadd.f32 %v662_v54, %v260_v50  ;;  %v623_v59 = vpop.f32.mrf.mxu1  ;;  %v664_v60 = vpop.f32.mrf.mxu0  ;;  %vm669_vm5 = vcmp.gt.f32.partialorder %v661_v52, 0.0  ;;  %v3096_v47 = vld [vmem:[%s4330_s5 + $0x6d0] ss:$28 sps:$4 sm:$0xff]   ;;  %v3104_v49 = vld [vmem:[%s4330_s5 + $0x69c] ss:$28 sps:$4 sm:$0xff]  }
 0x1b0   :  { %vm668_vm6 = vcmp.gt.f32.partialorder %v622_v57, 0.0  ;;  %v672_v61 = vmul.f32 0.2, %v622_v57  ;;  %v675_v0 = vsel %vm667_vm4, %v620_v51, %v671_v55  ;;  %v677_v2 = vsel %vm669_vm5, %v661_v52, %v673_v56  ;;  %v3099_v50 = vld [vmem:[%s4330_s5 + $0x318] ss:$28 sps:$4 sm:$0xff]  }
 0x1b1   :  { %v624_v62 = vpop.f32.mrf.mxu1  ;;  %v665_v63 = vpop.f32.mrf.mxu0  ;;  %vm670_vm7 = vcmp.gt.f32.partialorder %v663_v58, 0.0  ;;  %v674_v1 = vmul.f32 0.2, %v663_v58  ;;  %v3808_v7 = vpack.c.bf16 %v675_v0, %v675_v0  ;;  %v3815_v10 = vpack.c.bf16 %v677_v2, %v677_v2  ;;  %v3102_v51 = vld [vmem:[%s4330_s5 + $0x698] ss:$28 sps:$4 sm:$0xff]  }
 0x1b2   :  { %v676_v3 = vsel %vm668_vm6, %v622_v57, %v672_v61  ;;  %v3107_v52 = vld [vmem:[%s4330_s5 + $0x2e4] ss:$28 sps:$4 sm:$0xff]   ;;  %v3113_v56 = vld [vmem:[%s4330_s5 + $0x2ac] ss:$28 sps:$4 sm:$0xff]   ;;  %v3119_v60 = vld [vmem:[%s4330_s5 + $0x274] ss:$28 sps:$4 sm:$0xff]  }
 0x1b3   :  { %v3803_v4 = vpack.c.bf16 %v676_v3, %v676_v3  ;;  %v678_v5 = vsel %vm670_vm7, %v663_v58, %v674_v1  ;;  %v3110_v53 = vld [vmem:[%s4330_s5 + $0x664] ss:$28 sps:$4 sm:$0xff]   ;;  %v3116_v57 = vld [vmem:[%s4330_s5 + $0x62c] ss:$28 sps:$4 sm:$0xff]   ;;  %v3122_v61 = vld [vmem:[%s4330_s5 + $0x5f4] ss:$28 sps:$4 sm:$0xff]  }
 0x1b4   :  { %v3810_v8 = vpack.c.bf16 %v678_v5, %v678_v5  ;;  %v3105_v54 = vld [vmem:[%s4330_s5 + $0x2e0] ss:$28 sps:$4 sm:$0xff]   ;;  %v3111_v58 = vld [vmem:[%s4330_s5 + $0x2a8] ss:$28 sps:$4 sm:$0xff]   ;;  %v3117_v62 = vld [vmem:[%s4330_s5 + $0x270] ss:$28 sps:$4 sm:$0xff]  }
 0x1b5   :  { %2160 = vmatprep.mubr.bf16.mxu1 %v3803_v4  ;;  %v3108_v55 = vld [vmem:[%s4330_s5 + $0x660] ss:$28 sps:$4 sm:$0xff]   ;;  %v3114_v59 = vld [vmem:[%s4330_s5 + $0x628] ss:$28 sps:$4 sm:$0xff]   ;;  %v3120_v63 = vld [vmem:[%s4330_s5 + $0x5f0] ss:$28 sps:$4 sm:$0xff]  }
 0x1b6   :  { %2201 = vmatprep.mubr.bf16.mxu0 %v3810_v8  ;;  %2161 = vmatmul.mubr.bf16.vlgmr.msra.gmra.mxu1 %v3808_v7  ;;  %v3125_v0 = vld [vmem:[%s4330_s5 + $0x23c] ss:$28 sps:$4 sm:$0xff]   ;;  %v3131_v5 = vld [vmem:[%s4330_s5 + $0x204] ss:$28 sps:$4 sm:$0xff]  }
 0x1b7   :  { %2202 = vmatmul.mubr.bf16.vlgmr.msra.gmra.mxu0 %v3815_v10  ;;  %2211 = vmatpush1.bf16.msra.mxu1 %v3045_v6  ;;  %v3128_v1 = vld [vmem:[%s4330_s5 + $0x5bc] ss:$28 sps:$4 sm:$0xff]   ;;  %v3134_v6 = vld [vmem:[%s4330_s5 + $0x584] ss:$28 sps:$4 sm:$0xff]  }
 0x1b8   :  { %2252 = vmatpush1.bf16.msra.mxu0 %v3048_v9  ;;  %2242 = vmatprep.mubr.bf16.mxu1 %v3803_v4  ;;  %v3123_v2 = vld [vmem:[%s4330_s5 + $0x238] ss:$28 sps:$4 sm:$0xff]   ;;  %v3129_v9 = vld [vmem:[%s4330_s5 + $0x200] ss:$28 sps:$4 sm:$0xff]  }
 0x1b9   :  { %2283 = vmatprep.mubr.bf16.mxu0 %v3810_v8  ;;  %2212 = vmatprep.subr.bf16.mxu1 %v3053_v11  ;;  %v3126_v3 = vld [vmem:[%s4330_s5 + $0x5b8] ss:$28 sps:$4 sm:$0xff]   ;;  %v3132_v11 = vld [vmem:[%s4330_s5 + $0x580] ss:$28 sps:$4 sm:$0xff]  }
 0x1ba   :  { %2253 = vmatprep.subr.bf16.mxu0 %v3056_v12  ;;  %v3137_v12 = vld [vmem:[%s4330_s5 + $0x1cc] ss:$28 sps:$4 sm:$0xff]  }
 0x1bb   :  { %2213 = vmatpush1.bf16.msra.mxu1 %v3051_v13  ;;  %v3140_v13 = vld [vmem:[%s4330_s5 + $0x54c] ss:$28 sps:$4 sm:$0xff]  }
 0x1bc   :  { %2254 = vmatpush1.bf16.msra.mxu0 %v3054_v14  ;;  %2214 = vmatprep.subr.bf16.mxu1 %v3059_v15  ;;  %v3135_v14 = vld [vmem:[%s4330_s5 + $0x1c8] ss:$28 sps:$4 sm:$0xff]  }
 0x1bd   :  { %2255 = vmatprep.subr.bf16.mxu0 %v3062_v16  ;;  %v3138_v15 = vld [vmem:[%s4330_s5 + $0x548] ss:$28 sps:$4 sm:$0xff]   ;;  %v3143_v16 = vld [vmem:[%s4330_s5 + $0x19c] ss:$28 sps:$4 sm:$0xff]  }
 0x1bf   :  { %2215 = vmatpush1.bf16.msra.mxu1 %v3057_v17  ;;  %v3146_v17 = vld [vmem:[%s4330_s5 + $0x51c] ss:$28 sps:$4 sm:$0xff]  }
 0x1c0   :  { %2256 = vmatpush1.bf16.msra.mxu0 %v3060_v18  ;;  %2216 = vmatprep.subr.bf16.mxu1 %v3065_v19  ;;  %v3141_v18 = vld [vmem:[%s4330_s5 + $0x198] ss:$28 sps:$4 sm:$0xff]  }
 0x1c1   :  { %2257 = vmatprep.subr.bf16.mxu0 %v3068_v20  ;;  %v3144_v19 = vld [vmem:[%s4330_s5 + $0x518] ss:$28 sps:$4 sm:$0xff]   ;;  %v3149_v20 = vld [vmem:[%s4330_s5 + $0x164] ss:$28 sps:$4 sm:$0xff]  }
 0x1c3   :  { %2217 = vmatpush1.bf16.msra.mxu1 %v3063_v23  ;;  %v3152_v23 = vld [vmem:[%s4330_s5 + $0x4e4] ss:$28 sps:$4 sm:$0xff]  }
 0x1c4   :  { %2258 = vmatpush1.bf16.msra.mxu0 %v3066_v25  ;;  %2218 = vmatprep.subr.bf16.mxu1 %v3071_v26  ;;  %v3147_v25 = vld [vmem:[%s4330_s5 + $0x160] ss:$28 sps:$4 sm:$0xff]  }
 0x1c5   :  { %2259 = vmatprep.subr.bf16.mxu0 %v3074_v27  ;;  %v3150_v26 = vld [vmem:[%s4330_s5 + $0x4e0] ss:$28 sps:$4 sm:$0xff]   ;;  %v3155_v27 = vld [vmem:[%s4330_s5 + $0x12c] ss:$28 sps:$4 sm:$0xff]  }
 0x1c7   :  { %2219 = vmatpush1.bf16.msra.mxu1 %v3069_v28  ;;  %v3158_v28 = vld [vmem:[%s4330_s5 + $0x4ac] ss:$28 sps:$4 sm:$0xff]  }
 0x1c8   :  { %2260 = vmatpush1.bf16.msra.mxu0 %v3072_v29  ;;  %2220 = vmatprep.subr.bf16.mxu1 %v3077_v30  ;;  %v3153_v29 = vld [vmem:[%s4330_s5 + $0x128] ss:$28 sps:$4 sm:$0xff]  }
 0x1c9   :  { %2261 = vmatprep.subr.bf16.mxu0 %v3080_v31  ;;  %v3156_v30 = vld [vmem:[%s4330_s5 + $0x4a8] ss:$28 sps:$4 sm:$0xff]   ;;  %v3161_v31 = vld [vmem:[%s4330_s5 + $0xf4] ss:$28 sps:$4 sm:$0xff]  }
 0x1cb   :  { %2221 = vmatpush1.bf16.msra.mxu1 %v3075_v32  ;;  %v3164_v32 = vld [vmem:[%s4330_s5 + $0x474] ss:$28 sps:$4 sm:$0xff]  }
 0x1cc   :  { %2262 = vmatpush1.bf16.msra.mxu0 %v3078_v33  ;;  %2222 = vmatprep.subr.bf16.mxu1 %v3083_v34  ;;  %v3159_v33 = vld [vmem:[%s4330_s5 + $0xf0] ss:$28 sps:$4 sm:$0xff]  }
 0x1cd   :  { %2263 = vmatprep.subr.bf16.mxu0 %v3086_v35  ;;  %v3162_v34 = vld [vmem:[%s4330_s5 + $0x470] ss:$28 sps:$4 sm:$0xff]   ;;  %v3167_v35 = vld [vmem:[%s4330_s5 + $0xbc] ss:$28 sps:$4 sm:$0xff]  }
 0x1cf   :  { %2223 = vmatpush1.bf16.msra.mxu1 %v3081_v36  ;;  %v3170_v36 = vld [vmem:[%s4330_s5 + $0x43c] ss:$28 sps:$4 sm:$0xff]  }
 0x1d0   :  { %2264 = vmatpush1.bf16.msra.mxu0 %v3084_v37  ;;  %2224 = vmatprep.subr.bf16.mxu1 %v3089_v38  ;;  %v3165_v37 = vld [vmem:[%s4330_s5 + $0xb8] ss:$28 sps:$4 sm:$0xff]  }
 0x1d1   :  { %2265 = vmatprep.subr.bf16.mxu0 %v3092_v39  ;;  %v3168_v38 = vld [vmem:[%s4330_s5 + $0x438] ss:$28 sps:$4 sm:$0xff]   ;;  %v3173_v39 = vld [vmem:[%s4330_s5 + $0x84] ss:$28 sps:$4 sm:$0xff]  }
 0x1d3   :  { %2225 = vmatpush1.bf16.msra.mxu1 %v3087_v40  ;;  %v3176_v40 = vld [vmem:[%s4330_s5 + $0x404] ss:$28 sps:$4 sm:$0xff]  }
 0x1d4   :  { %2266 = vmatpush1.bf16.msra.mxu0 %v3090_v41  ;;  %2226 = vmatprep.subr.bf16.mxu1 %v3095_v43  ;;  %v3171_v41 = vld [vmem:[%s4330_s5 + $0x80] ss:$28 sps:$4 sm:$0xff]  }
 0x1d5   :  { %2267 = vmatprep.subr.bf16.mxu0 %v3098_v45  ;;  %v3174_v43 = vld [vmem:[%s4330_s5 + $0x400] ss:$28 sps:$4 sm:$0xff]   ;;  %v3179_v45 = vld [vmem:[%s4330_s5 + $0x4c] ss:$28 sps:$4 sm:$0xff]  }
 0x1d7   :  { %2227 = vmatpush2.bf16.msra.mxu1 %v3093_v46  ;;  %v3182_v46 = vld [vmem:[%s4330_s5 + $0x3cc] ss:$28 sps:$4 sm:$0xff]  }
 0x1d8   :  { %2268 = vmatpush2.bf16.msra.mxu0 %v3096_v47  ;;  %2228 = vmatprep.subr.bf16.mxu1 %v3101_v48  ;;  %v3177_v47 = vld [vmem:[%s4330_s5 + $0x48] ss:$28 sps:$4 sm:$0xff]  }
 0x1d9   :  { %2269 = vmatprep.subr.bf16.mxu0 %v3104_v49  ;;  %v3180_v48 = vld [vmem:[%s4330_s5 + $0x3c8] ss:$28 sps:$4 sm:$0xff]   ;;  %v3185_v49 = vld [vmem:[%s4330_s5 + $0x14] ss:$28 sps:$4 sm:$0xff]  }
 0x1db   :  { %2229 = vmatpush2.bf16.msra.mxu1 %v3099_v50  ;;  %v3188_v50 = vld [vmem:[%s4330_s5 + $0x394] ss:$28 sps:$4 sm:$0xff]  }
 0x1dc   :  { %2270 = vmatpush2.bf16.msra.mxu0 %v3102_v51  ;;  %2230 = vmatprep.subr.bf16.mxu1 %v3107_v52  ;;  %v3183_v51 = vld [vmem:[%s4330_s5 + $0x10] ss:$28 sps:$4 sm:$0xff]  }
 0x1dd   :  { %2271 = vmatprep.subr.bf16.mxu0 %v3110_v53  ;;  %v3186_v52 = vld [vmem:[%s4330_s5 + $0x390] ss:$28 sps:$4 sm:$0xff]   ;;  %v3191_v53 = vld [vmem:[%s4330_s5 + $0x35c] ss:$28 sps:$4 sm:$0xff]  }
 0x1df   :  { %2231 = vmatpush2.bf16.msra.mxu1 %v3105_v54  ;;  %v3194_v54 = vld [vmem:[%s4330_s5 + $0x6dc] ss:$28 sps:$4 sm:$0xff]  }
 0x1e0   :  { %2272 = vmatpush2.bf16.msra.mxu0 %v3108_v55  ;;  %2232 = vmatprep.subr.bf16.mxu1 %v3113_v56  ;;  %v3189_v55 = vld [vmem:[%s4330_s5 + $0x358] ss:$28 sps:$4 sm:$0xff]  }
 0x1e1   :  { %2273 = vmatprep.subr.bf16.mxu0 %v3116_v57  ;;  %v3192_v56 = vld [vmem:[%s4330_s5 + $0x6d8] ss:$28 sps:$4 sm:$0xff]   ;;  %v3197_v57 = vld [vmem:[%s4330_s5 + $0x324] ss:$28 sps:$4 sm:$0xff]  }
 0x1e3   :  { %2233 = vmatpush2.bf16.msra.mxu1 %v3111_v58  ;;  %v3200_v58 = vld [vmem:[%s4330_s5 + $0x6a4] ss:$28 sps:$4 sm:$0xff]  }
 0x1e4   :  { %2274 = vmatpush2.bf16.msra.mxu0 %v3114_v59  ;;  %2234 = vmatprep.subr.bf16.mxu1 %v3119_v60  ;;  %v3195_v59 = vld [vmem:[%s4330_s5 + $0x320] ss:$28 sps:$4 sm:$0xff]  }
 0x1e5   :  { %2275 = vmatprep.subr.bf16.mxu0 %v3122_v61  ;;  %v3198_v60 = vld [vmem:[%s4330_s5 + $0x6a0] ss:$28 sps:$4 sm:$0xff]   ;;  %v3203_v61 = vld [vmem:[%s4330_s5 + $0x2ec] ss:$28 sps:$4 sm:$0xff]  }
 0x1e7   :  { %2235 = vmatpush2.bf16.msra.mxu1 %v3117_v62  ;;  %v3206_v62 = vld [vmem:[%s4330_s5 + $0x66c] ss:$28 sps:$4 sm:$0xff]  }
 0x1e8   :  { %2276 = vmatpush2.bf16.msra.mxu0 %v3120_v63  ;;  %2236 = vmatprep.subr.bf16.mxu1 %v3125_v0  ;;  %v3201_v63 = vld [vmem:[%s4330_s5 + $0x2e8] ss:$28 sps:$4 sm:$0xff]  }
 0x1e9   :  { %2277 = vmatprep.subr.bf16.mxu0 %v3128_v1  ;;  %v3204_v0 = vld [vmem:[%s4330_s5 + $0x668] ss:$28 sps:$4 sm:$0xff]   ;;  %v3209_v1 = vld [vmem:[%s4330_s5 + $0x2b4] ss:$28 sps:$4 sm:$0xff]  }
 0x1eb   :  { %2237 = vmatpush2.bf16.msra.mxu1 %v3123_v2  ;;  %v3212_v2 = vld [vmem:[%s4330_s5 + $0x634] ss:$28 sps:$4 sm:$0xff]  }
 0x1ec   :  { %2278 = vmatpush2.bf16.msra.mxu0 %v3126_v3  ;;  %2238 = vmatprep.subr.bf16.mxu1 %v3131_v5  ;;  %v3207_v3 = vld [vmem:[%s4330_s5 + $0x2b0] ss:$28 sps:$4 sm:$0xff]  }
 0x1ed   :  { %2279 = vmatprep.subr.bf16.mxu0 %v3134_v6  ;;  %v3210_v5 = vld [vmem:[%s4330_s5 + $0x630] ss:$28 sps:$4 sm:$0xff]   ;;  %v3215_v6 = vld [vmem:[%s4330_s5 + $0x27c] ss:$28 sps:$4 sm:$0xff]  }
 0x1ef   :  { %2239 = vmatpush2.bf16.msra.mxu1 %v3129_v9  ;;  %v3218_v9 = vld [vmem:[%s4330_s5 + $0x5fc] ss:$28 sps:$4 sm:$0xff]  }
 0x1f0   :  { %2280 = vmatpush2.bf16.msra.mxu0 %v3132_v11  ;;  %2240 = vmatprep.subr.bf16.mxu1 %v3137_v12  ;;  %v3213_v11 = vld [vmem:[%s4330_s5 + $0x278] ss:$28 sps:$4 sm:$0xff]  }
 0x1f1   :  { %2281 = vmatprep.subr.bf16.mxu0 %v3140_v13  ;;  %v3216_v12 = vld [vmem:[%s4330_s5 + $0x5f8] ss:$28 sps:$4 sm:$0xff]   ;;  %v3221_v13 = vld [vmem:[%s4330_s5 + $0x244] ss:$28 sps:$4 sm:$0xff]  }
 0x1f3   :  { %2241 = vmatpush2.bf16.msra.mxu1 %v3135_v14  ;;  %v3224_v14 = vld [vmem:[%s4330_s5 + $0x5c4] ss:$28 sps:$4 sm:$0xff]  }
 0x1f4   :  { %2282 = vmatpush2.bf16.msra.mxu0 %v3138_v15  ;;  %2292 = vmatprep.subr.bf16.mxu1 %v3143_v16  ;;  %v3219_v15 = vld [vmem:[%s4330_s5 + $0x240] ss:$28 sps:$4 sm:$0xff]  }
 0x1f5   :  { %2333 = vmatprep.subr.bf16.mxu0 %v3146_v17  ;;  %v3222_v16 = vld [vmem:[%s4330_s5 + $0x5c0] ss:$28 sps:$4 sm:$0xff]   ;;  %v3227_v17 = vld [vmem:[%s4330_s5 + $0x20c] ss:$28 sps:$4 sm:$0xff]  }
 0x1f6   :  { %2243 = vmatmul.mubr.bf16.vlgmr.msra.gmra.mxu1 %v3808_v7 }
 0x1f7   :  { %2284 = vmatmul.mubr.bf16.vlgmr.msra.gmra.mxu0 %v3815_v10  ;;  %2293 = vmatpush1.bf16.msra.mxu1 %v3141_v18  ;;  %v3230_v18 = vld [vmem:[%s4330_s5 + $0x58c] ss:$28 sps:$4 sm:$0xff]  }
 0x1f8   :  { %2324 = vmatprep.mubr.bf16.mxu1 %v3803_v4  ;;  %2334 = vmatpush1.bf16.msra.mxu0 %v3144_v19  ;;  %v3225_v19 = vld [vmem:[%s4330_s5 + $0x208] ss:$28 sps:$4 sm:$0xff]  }
 0x1f9   :  { %2365 = vmatprep.mubr.bf16.mxu0 %v3810_v8  ;;  %2294 = vmatprep.subr.bf16.mxu1 %v3149_v20  ;;  %v3228_v20 = vld [vmem:[%s4330_s5 + $0x588] ss:$28 sps:$4 sm:$0xff]  }
 0x1fa   :  { %2335 = vmatprep.subr.bf16.mxu0 %v3152_v23  ;;  %v3233_v23 = vld [vmem:[%s4330_s5 + $0x1d4] ss:$28 sps:$4 sm:$0xff]  }
 0x1fb   :  { %2295 = vmatpush1.bf16.msra.mxu1 %v3147_v25  ;;  %v3236_v25 = vld [vmem:[%s4330_s5 + $0x554] ss:$28 sps:$4 sm:$0xff]  }
 0x1fc   :  { %2336 = vmatpush1.bf16.msra.mxu0 %v3150_v26  ;;  %2296 = vmatprep.subr.bf16.mxu1 %v3155_v27  ;;  %v3231_v26 = vld [vmem:[%s4330_s5 + $0x1d0] ss:$28 sps:$4 sm:$0xff]  }
 0x1fd   :  { %2337 = vmatprep.subr.bf16.mxu0 %v3158_v28  ;;  %v3234_v27 = vld [vmem:[%s4330_s5 + $0x550] ss:$28 sps:$4 sm:$0xff]   ;;  %v3237_v28 = vld [vmem:[%s4330_s5 + $0x360] ss:$28 sps:$4 sm:$0xff]  }
 0x1ff   :  { %2297 = vmatpush1.bf16.msra.mxu1 %v3153_v29  ;;  %v3238_v29 = vld [vmem:[%s4330_s5 + $0x6e0] ss:$28 sps:$4 sm:$0xff]  }
 0x200   :  { %2338 = vmatpush1.bf16.msra.mxu0 %v3156_v30  ;;  %2298 = vmatprep.subr.bf16.mxu1 %v3161_v31  ;;  %v3239_v30 = vld [vmem:[%s4330_s5 + $0x1a0] ss:$28 sps:$4 sm:$0xff]  }
 0x201   :  { %2339 = vmatprep.subr.bf16.mxu0 %v3164_v32  ;;  %v3240_v31 = vld [vmem:[%s4330_s5 + $0x520] ss:$28 sps:$4 sm:$0xff]   ;;  %v3241_v32 = vld [vmem:[%s4330_s5 + $0x328] ss:$28 sps:$4 sm:$0xff]  }
 0x203   :  { %2299 = vmatpush1.bf16.msra.mxu1 %v3159_v33  ;;  %v3242_v33 = vld [vmem:[%s4330_s5 + $0x6a8] ss:$28 sps:$4 sm:$0xff]  }
 0x204   :  { %2340 = vmatpush1.bf16.msra.mxu0 %v3162_v34  ;;  %2300 = vmatprep.subr.bf16.mxu1 %v3167_v35  ;;  %v3243_v34 = vld [vmem:[%s4330_s5 + $0x168] ss:$28 sps:$4 sm:$0xff]  }
 0x205   :  { %2341 = vmatprep.subr.bf16.mxu0 %v3170_v36  ;;  %v3244_v35 = vld [vmem:[%s4330_s5 + $0x4e8] ss:$28 sps:$4 sm:$0xff]   ;;  %v3245_v36 = vld [vmem:[%s4330_s5 + $0x2f0] ss:$28 sps:$4 sm:$0xff]  }
 0x207   :  { %2301 = vmatpush1.bf16.msra.mxu1 %v3165_v37  ;;  %v3246_v37 = vld [vmem:[%s4330_s5 + $0x670] ss:$28 sps:$4 sm:$0xff]  }
 0x208   :  { %2342 = vmatpush1.bf16.msra.mxu0 %v3168_v38  ;;  %2302 = vmatprep.subr.bf16.mxu1 %v3173_v39  ;;  %v3248_v38 = vld [vmem:[%s4330_s5 + $0x4b0] ss:$28 sps:$4 sm:$0xff]   ;;  %v3250_v39 = vld [vmem:[%s4330_s5 + $0x638] ss:$28 sps:$4 sm:$0xff]  }
 0x209   :  { %2343 = vmatprep.subr.bf16.mxu0 %v3176_v40  ;;  %v3251_v40 = vld [vmem:[%s4330_s5 + $0xf8] ss:$28 sps:$4 sm:$0xff]  }
 0x20b   :  { %2303 = vmatpush1.bf16.msra.mxu1 %v3171_v41  ;;  %v3252_v41 = vld [vmem:[%s4330_s5 + $0x478] ss:$28 sps:$4 sm:$0xff]  }
 0x20c   :  { %2344 = vmatpush1.bf16.msra.mxu0 %v3174_v43  ;;  %2304 = vmatprep.subr.bf16.mxu1 %v3179_v45  ;;  %v3253_v43 = vld [vmem:[%s4330_s5 + $0x280] ss:$28 sps:$4 sm:$0xff]  }
 0x20d   :  { %2345 = vmatprep.subr.bf16.mxu0 %v3182_v46  ;;  %v3254_v45 = vld [vmem:[%s4330_s5 + $0x600] ss:$28 sps:$4 sm:$0xff]  }
 0x20e   :  { %v3255_v46 = vld [vmem:[%s4330_s5 + $0xc0] ss:$28 sps:$4 sm:$0xff]  }
 0x20f   :  { %2305 = vmatpush1.bf16.msra.mxu1 %v3177_v47  ;;  %v3256_v47 = vld [vmem:[%s4330_s5 + $0x440] ss:$28 sps:$4 sm:$0xff]  }
 0x210   :  { %2346 = vmatpush1.bf16.msra.mxu0 %v3180_v48  ;;  %2306 = vmatprep.subr.bf16.mxu1 %v3185_v49  ;;  %v3257_v48 = vld [vmem:[%s4330_s5 + $0x248] ss:$28 sps:$4 sm:$0xff]  }
 0x211   :  { %2347 = vmatprep.subr.bf16.mxu0 %v3188_v50  ;;  %v3258_v49 = vld [vmem:[%s4330_s5 + $0x5c8] ss:$28 sps:$4 sm:$0xff]  }
 0x212   :  { %v3259_v50 = vld [vmem:[%s4330_s5 + $0x88] ss:$28 sps:$4 sm:$0xff]  }
 0x213   :  { %2307 = vmatpush1.bf16.msra.mxu1 %v3183_v51  ;;  %v3260_v51 = vld [vmem:[%s4330_s5 + $0x408] ss:$28 sps:$4 sm:$0xff]  }
 0x214   :  { %2348 = vmatpush1.bf16.msra.mxu0 %v3186_v52  ;;  %2308 = vmatprep.subr.bf16.mxu1 %v3191_v53  ;;  %v3261_v52 = vld [vmem:[%s4330_s5 + $0x210] ss:$28 sps:$4 sm:$0xff]  }
 0x215   :  { %2349 = vmatprep.subr.bf16.mxu0 %v3194_v54  ;;  %v3262_v53 = vld [vmem:[%s4330_s5 + $0x590] ss:$28 sps:$4 sm:$0xff]  }
 0x216   :  { %v3263_v54 = vld [vmem:[%s4330_s5 + $0x50] ss:$28 sps:$4 sm:$0xff]  }
 0x217   :  { %2309 = vmatpush2.bf16.msra.mxu1 %v3189_v55  ;;  %v3264_v55 = vld [vmem:[%s4330_s5 + $0x3d0] ss:$28 sps:$4 sm:$0xff]  }
 0x218   :  { %2350 = vmatpush2.bf16.msra.mxu0 %v3192_v56  ;;  %2310 = vmatprep.subr.bf16.mxu1 %v3197_v57  ;;  %v3265_v56 = vld [vmem:[%s4330_s5 + $0x1d8] ss:$28 sps:$4 sm:$0xff]  }
 0x219   :  { %2351 = vmatprep.subr.bf16.mxu0 %v3200_v58  ;;  %v3266_v57 = vld [vmem:[%s4330_s5 + $0x558] ss:$28 sps:$4 sm:$0xff]  }
 0x21a   :  { %v3267_v58 = vld [vmem:[%s4330_s5 + $0x18] ss:$28 sps:$4 sm:$0xff]  }
 0x21b   :  { %2311 = vmatpush2.bf16.msra.mxu1 %v3195_v59  ;;  %v3268_v59 = vld [vmem:[%s4330_s5 + $0x398] ss:$28 sps:$4 sm:$0xff]  }
 0x21c   :  { %2352 = vmatpush2.bf16.msra.mxu0 %v3198_v60  ;;  %2312 = vmatprep.subr.bf16.mxu1 %v3203_v61  ;;  %v4304_v60 = vld [vmem:[%s4331_s6] sm:$0x7f] }
 0x21d   :  { %2353 = vmatprep.subr.bf16.mxu0 %v3206_v62  ;;  %v944_v61 = vrot.slane %v4304_v60, %v3590_v22  ;;  %v948_v62 = vrot.slane %v4304_v60, %v3596_v24  ;;  %v952_v24 = vrot.slane %v4304_v60, %v255_v42 }
 0x21f   :  { %2313 = vmatpush2.bf16.msra.mxu1 %v3201_v63 }
 0x220   :  { %2354 = vmatpush2.bf16.msra.mxu0 %v3204_v0  ;;  %2314 = vmatprep.subr.bf16.mxu1 %v3209_v1 }
 0x221   :  { %2355 = vmatprep.subr.bf16.mxu0 %v3212_v2 }
 0x223   :  { %2315 = vmatpush2.bf16.msra.mxu1 %v3207_v3 }
 0x224   :  { %2356 = vmatpush2.bf16.msra.mxu0 %v3210_v5  ;;  %2316 = vmatprep.subr.bf16.mxu1 %v3215_v6 }
 0x225   :  { %2357 = vmatprep.subr.bf16.mxu0 %v3218_v9 }
 0x227   :  { %2317 = vmatpush2.bf16.msra.mxu1 %v3213_v11 }
 0x228   :  { %2358 = vmatpush2.bf16.msra.mxu0 %v3216_v12  ;;  %2318 = vmatprep.subr.bf16.mxu1 %v3221_v13 }
 0x229   :  { %2359 = vmatprep.subr.bf16.mxu0 %v3224_v14  ;;  %v956_v14 = vrot.slane %v4304_v60, %v259_v44  ;;  %v959_v44 = vsub.s32 4, %v3587_v21 }
 0x22b   :  { %2319 = vmatpush2.bf16.msra.mxu1 %v3219_v15 }
 0x22c   :  { %2360 = vmatpush2.bf16.msra.mxu0 %v3222_v16  ;;  %2320 = vmatprep.subr.bf16.mxu1 %v3227_v17 }
 0x22d   :  { %2361 = vmatprep.subr.bf16.mxu0 %v3230_v18 }
 0x22f   :  { %2321 = vmatpush2.bf16.msra.mxu1 %v3225_v19 }
 0x230   :  { %2362 = vmatpush2.bf16.msra.mxu0 %v3228_v20  ;;  %2322 = vmatprep.subr.bf16.mxu1 %v3233_v23 }
 0x231   :  { %2363 = vmatprep.subr.bf16.mxu0 %v3236_v25 }
 0x233   :  { %2323 = vmatpush2.bf16.msra.mxu1 %v3231_v26 }
 0x234   :  { %2364 = vmatpush2.bf16.msra.mxu0 %v3234_v27  ;;  %2787 = vmatprep.subr.bf16.mxu1 %v3237_v28 }
 0x235   :  { %2809 = vmatprep.subr.bf16.mxu0 %v3238_v29 }
 0x236   :  { %2325 = vmatmul.mubr.bf16.vlgmr.msra.gmra.mxu1 %v3808_v7 }
 0x237   :  { %2366 = vmatmul.mubr.bf16.vlgmr.msra.gmra.mxu0 %v3815_v10  ;;  %2788 = vmatpush3.bf16.msra.mxu1 %v3239_v30 }
 0x238   :  { %2406 = vmatprep.mubr.bf16.mxu1 %v3803_v4  ;;  %2810 = vmatpush3.bf16.msra.mxu0 %v3240_v31  ;;  %v3247_v4 = vld [vmem:[%s4330_s5 + $0x130] ss:$28 sps:$4 sm:$0xff]   ;;  %v963_v31 = vsub.s32 5, %v3587_v21 }
 0x239   :  { %2446 = vmatprep.mubr.bf16.mxu0 %v3810_v8  ;;  %2789 = vmatprep.subr.bf16.mxu1 %v3241_v32  ;;  %v3249_v8 = vld [vmem:[%s4330_s5 + $0x2b8] ss:$28 sps:$4 sm:$0xff]   ;;  %v960_v32 = vrot.slane %v4304_v60, %v959_v44  ;;  %s3306_s5 = smov [#allocation2]  }
 0x23a   :  { %2811 = vmatprep.subr.bf16.mxu0 %v3242_v33  ;;  %v964_v33 = vrot.slane %v4304_v60, %v963_v31  ;;  %s2475_s6 = sshll.u32 %s3306_s5, 4  ;;  %s2476_s6 = int_to_ptr.vmem [resolvable:$true] %s2475_s6 }
 0x23b   :  { %2790 = vmatpush3.bf16.msra.mxu1 %v3243_v34  ;;  %s3283_s17 = scalar_lea.vmem %s2476_s6, 896  ;;  %p3288_p1 = scmp.lt.s32.totalorder %s2476_s6, %s2476_s6 }
 0x23c   :  { %2812 = vmatpush3.bf16.msra.mxu0 %v3244_v35  ;;  %2791 = vmatprep.subr.bf16.mxu1 %v3245_v36  ;;  %p3284_p0 = scmp.ne.s32.totalorder %s2476_s6, %s3283_s17  ;;  %p3289_p2 = scmp.lt.s32.totalorder %s3283_s17, %s3283_s17 }
 0x23d   :  { %2813 = vmatprep.subr.bf16.mxu0 %v3246_v37 }
 0x23e   :  { %p3290_p3 = por %p3289_p2, %p3288_p1 }
 0x23f   :  { %2792 = vmatpush3.bf16.msra.mxu1 %v3247_v4 }
 0x240   :  { %2814 = vmatpush3.bf16.msra.mxu0 %v3248_v38  ;;  %2793 = vmatprep.subr.bf16.mxu1 %v3249_v8  ;;  %p3291_p4 = pnand %p3290_p3, %p3284_p0 }
 0x241   :  { %2815 = vmatprep.subr.bf16.mxu0 %v3250_v39 }
 0x243   :  { %2794 = vmatpush3.bf16.msra.mxu1 %v3251_v40 }
 0x244   :  { %2816 = vmatpush3.bf16.msra.mxu0 %v3252_v41  ;;  %2795 = vmatprep.subr.bf16.mxu1 %v3253_v43 }
 0x245   :  { %2817 = vmatprep.subr.bf16.mxu0 %v3254_v45 }
 0x247   :  { %2796 = vmatpush3.bf16.msra.mxu1 %v3255_v46 }
 0x248   :  { %2818 = vmatpush3.bf16.msra.mxu0 %v3256_v47  ;;  %2797 = vmatprep.subr.bf16.mxu1 %v3257_v48  ;;  %v967_v48 = vsub.s32 6, %v3587_v21 }
 0x249   :  { %2819 = vmatprep.subr.bf16.mxu0 %v3258_v49 }
 0x24b   :  { %2798 = vmatpush3.bf16.msra.mxu1 %v3259_v50 }
 0x24c   :  { %2820 = vmatpush3.bf16.msra.mxu0 %v3260_v51  ;;  %2799 = vmatprep.subr.bf16.mxu1 %v3261_v52  ;;  %v968_v51 = vrot.slane %v4304_v60, %v967_v48 }
 0x24d   :  { %2821 = vmatprep.subr.bf16.mxu0 %v3262_v53 }
 0x24f   :  { %2800 = vmatpush3.bf16.msra.mxu1 %v3263_v54 }
 0x250   :  { %2822 = vmatpush3.bf16.msra.mxu0 %v3264_v55  ;;  %2801 = vmatprep.subr.bf16.mxu1 %v3265_v56 }
 0x251   :  { %2823 = vmatprep.subr.bf16.mxu0 %v3266_v57 }
 0x253   :  { %2802 = vmatpush3.bf16.msra.mxu1 %v3267_v58 }
 0x254   :  { %2824 = vmatpush3.bf16.msra.mxu0 %v3268_v59 }
 0x256   :  { %2407 = vmatmul.mubr.bf16.vlgmr.msra.gmra.mxu1 %v3808_v7 }
 0x257   :  { %2447 = vmatmul.mubr.bf16.vlgmr.msra.gmra.mxu0 %v3815_v10 }
 0x276   :  { %v2162_v63 = vpop.f32.mrf.mxu1 }
 0x277   :  { %v2163_v0 = vadd.f32 %v2162_v63, %v944_v61  ;;  %v2203_v1 = vpop.f32.mrf.mxu0 }
 0x278   :  { %v2164_v2 = vpop.f32.mrf.mxu1 }
 0x279   :  { %v2204_v3 = vadd.f32 %v2203_v1, %v2163_v0  ;;  %v2165_v5 = vadd.f32 %v2164_v2, %v948_v62  ;;  %v2205_v7 = vpop.f32.mrf.mxu0 }
 0x27a   :  { %v2166_v6 = vpop.f32.mrf.mxu1 }
 0x27b   :  { %3269 = vtanh.f32 %v2204_v3  ;;  %v2206_v10 = vadd.f32 %v2205_v7, %v2165_v5  ;;  %v2207_v9 = vpop.f32.mrf.mxu0 }
 0x27c   :  { %v2167_v11 = vpop.f32.mrf.mxu1 }
 0x27d   :  { %3271 = vtanh.f32 %v2206_v10  ;;  %v2208_v12 = vpop.f32.mrf.mxu0 }
 0x288   :  { %v3270_v13 = vpop.eup %3269 }
 0x289   :  { %2461 = vst [vmem:[#allocation2] sm:$0xff] %v3270_v13 }
 0x28a   :  { %v3272_v22 = vpop.eup %3271 }
 0x28b   :  { %2462 = vst [vmem:[#allocation2 + $0x8] sm:$0xff] %v3272_v22 }
 0x2b6   :  { %v2244_v15 = vpop.f32.mrf.mxu1 }
 0x2b7   :  { %v2245_v16 = vadd.f32 %v2244_v15, %v952_v24  ;;  %v2285_v17 = vpop.f32.mrf.mxu0 }
 0x2b8   :  { %v2246_v18 = vpop.f32.mrf.mxu1 }
 0x2b9   :  { %v2286_v19 = vadd.f32 %v2285_v17, %v2245_v16  ;;  %v2247_v20 = vadd.f32 %v2246_v18, %v956_v14  ;;  %v2287_v23 = vpop.f32.mrf.mxu0 }
 0x2ba   :  { %v2248_v25 = vpop.f32.mrf.mxu1 }
 0x2bb   :  { %3273 = vtanh.f32 %v2286_v19  ;;  %v2288_v26 = vadd.f32 %v2287_v23, %v2247_v20  ;;  %v2289_v27 = vpop.f32.mrf.mxu0 }
 0x2bc   :  { %v2249_v28 = vpop.f32.mrf.mxu1 }
 0x2bd   :  { %3275 = vtanh.f32 %v2288_v26  ;;  %v2290_v29 = vpop.f32.mrf.mxu0 }
 0x2c8   :  { %v3274_v30 = vpop.eup %3273 }
 0x2c9   :  { %2463 = vst [vmem:[#allocation2 + $0x10] sm:$0xff] %v3274_v30 }
 0x2ca   :  { %v3276_v42 = vpop.eup %3275 }
 0x2cb   :  { %2464 = vst [vmem:[#allocation2 + $0x18] sm:$0xff] %v3276_v42 }
 0x2f6   :  { %v2326_v34 = vpop.f32.mrf.mxu1 }
 0x2f7   :  { %v2327_v35 = vadd.f32 %v2326_v34, %v960_v32  ;;  %v2367_v36 = vpop.f32.mrf.mxu0 }
 0x2f8   :  { %v2328_v37 = vpop.f32.mrf.mxu1 }
 0x2f9   :  { %v2368_v4 = vadd.f32 %v2367_v36, %v2327_v35  ;;  %v2329_v38 = vadd.f32 %v2328_v37, %v964_v33  ;;  %v2369_v8 = vpop.f32.mrf.mxu0 }
 0x2fa   :  { %v2330_v39 = vpop.f32.mrf.mxu1 }
 0x2fb   :  { %3277 = vtanh.f32 %v2368_v4  ;;  %v2370_v40 = vadd.f32 %v2369_v8, %v2329_v38  ;;  %v2371_v41 = vpop.f32.mrf.mxu0 }
 0x2fc   :  { %v2331_v43 = vpop.f32.mrf.mxu1 }
 0x2fd   :  { %3279 = vtanh.f32 %v2370_v40  ;;  %v2372_v45 = vpop.f32.mrf.mxu0 }
 0x308   :  { %v3278_v46 = vpop.eup %3277 }
 0x309   :  { %2465 = vst [vmem:[#allocation2 + $0x20] sm:$0xff] %v3278_v46 }
 0x30a   :  { %v3280_v47 = vpop.eup %3279 }
 0x30b   :  { %2466 = vst [vmem:[#allocation2 + $0x28] sm:$0xff] %v3280_v47 }
 0x316   :  { %v2803_v49 = vpop.f32.mrf.mxu1 }
 0x317   :  { %v2825_v50 = vpop.f32.mrf.mxu0 }
 0x318   :  { %v2804_v52 = vpop.f32.mrf.mxu1 }
 0x319   :  { %v2805_v53 = vadd.f32 %v2804_v52, %v2803_v49  ;;  %v2826_v54 = vpop.f32.mrf.mxu0 }
 0x31a   :  { %v2806_v55 = vpop.f32.mrf.mxu1  ;;  %v2827_v57 = vadd.f32 %v2826_v54, %v2825_v50 }
 0x31b   :  { %v2409_v56 = vadd.f32 %v2805_v53, %v968_v51  ;;  %v2828_v58 = vpop.f32.mrf.mxu0 }
 0x31c   :  { %v2807_v59 = vpop.f32.mrf.mxu1 }
 0x31d   :  { %v2449_v61 = vadd.f32 %v2827_v57, %v2409_v56  ;;  %v2829_v62 = vpop.f32.mrf.mxu0 }
 0x31f   :  { %3281 = vtanh.f32 %v2449_v61 }
 0x32c   :  { %v3282_v21 = vpop.eup %3281 }
 0x32d   :  { %2468 = vst.msk [vmem:[#allocation2 + $0x30] sm:$0xff] %vm2467_vm8, %v3282_v21 }
 0x32e   :  { %3294 = shalt.err (!%p3291_p4)
}
 0x32f   :  { %2478 = dma.vmem_to_hbm [thread:$0]  %s2476_s6, 896, %s4332_s7, [#allocation3]  }
 0x330   :  { %3303 = dma.done.wait [#allocation3], 896  }
 0x331   :  { %3304 = vsyncadd [#allocation3], 4294966400 }
 0x332   :  { %2482 = vsyncpa [#allocation3], 1 }

</bundles_post_ra>
